<compile_context>
chip_gen: v7x
topology: tpu7x:2x2x1
jax: 0.10.0
libtpu: 0.0.40
codegen_flags: <defaults>
</compile_context>

<pallas_src>
import math

import jax
import jax.numpy as jnp
from jax.experimental import pallas as pl
from jax.experimental.pallas import tpu as pltpu


def _tada_kernel(p_ref, w_ref, o_ref):
    # p_ref: (K, T*P)      im2col patches for one batch (routing already folded into x):
    #                      K = KH*KW*Cin on the sublane axis, (t*P + h*Wout + w) lane-dense.
    # w_ref: (Cout, K)     shared conv weight, transposed; resident across the grid.
    # o_ref: (1, Cout, T*P) output block for one batch, already in final layout.
    res = jnp.dot(w_ref[...], p_ref[...],
                  preferred_element_type=jnp.float32,
                  precision=jax.lax.Precision.HIGHEST)      # one wide MXU dot per step
    o_ref[0] = res.astype(o_ref.dtype)


def tada_conv2d_cinada_v(x, routing_weight, weight, *, padding=(1, 1)):
    """x: (B, Cin, T, H, W); routing_weight: (B, Cin, T, 1, 1);
    weight: (1, 1, Cout, Cin, KH, KW). Returns (B, Cout, T, Hout, Wout).
    stride=1, dilation=1, groups=1, bias=False."""
    b, cin, t, h, w = x.shape
    _, _, cout, cin_w, kh, kw = weight.shape
    assert cin_w == cin
    ph, pw = padding
    hout = h + 2 * ph - kh + 1
    wout = w + 2 * pw - kw + 1
    bt = b * t
    p_cols = hout * wout
    tp = t * p_cols                     # lane extent of one grid block
    k_dim = kh * kw * cin

    assert tp % 128 == 0, "per-batch lane extent must be 128-aligned"
    # TODO(synk): pad Hout*Wout up to a multiple of 128 for spatial sizes like 14x14.

    # ---- glue (plain JAX): layout plumbing only, no large relayout passes ----
    # 1) fold the (b, cin, t) routing factor into x (algebraically identical to scaling
    #    the per-(b,t) weights: groups=1 and routing is spatially constant).
    xs = x * routing_weight                                          # (B, Cin, T, H, W)
    # 2) channel-major + spatial zero-pad (only a ~64 KiB relayout).
    xc = jnp.transpose(xs, (1, 0, 2, 3, 4)).reshape(cin, bt, h, w)   # (Cin, BT, H, W)
    xp = jnp.pad(xc, ((0, 0), (0, 0), (ph, ph), (pw, pw)))
    # 3) transpose-free im2col: stack the KH*KW tap windows on a new leading axis and
    #    reshape straight into the (K, BT*P) lane-dense layout the kernel consumes.
    taps = [xp[:, :, dh:dh + hout, dw:dw + wout]
            for dh in range(kh) for dw in range(kw)]                 # (Cin, BT, Hout, Wout) each
    patches_t = jnp.stack(taps, axis=0).reshape(k_dim, bt * p_cols)  # (K, BT*P)

    # weight -> (Cout, K), same (tap-major, cin-minor) K ordering as the patches.
    w_t = jnp.transpose(weight.reshape(cout, cin, kh, kw),
                        (0, 2, 3, 1)).reshape(cout, k_dim)

    out = pl.pallas_call(
        _tada_kernel,
        out_shape=jax.ShapeDtypeStruct((b, cout, tp), x.dtype),
        grid_spec=pltpu.PrefetchScalarGridSpec(
            num_scalar_prefetch=0,
            grid=(b,),                                               # one batch per step
            in_specs=[
                pl.BlockSpec((k_dim, tp), lambda i: (0, i)),         # (36, 2048) patch slab
                pl.BlockSpec((cout, k_dim), lambda i: (0, 0)),       # resident weight
            ],
            out_specs=pl.BlockSpec((1, cout, tp), lambda i: (i, 0, 0)),
        ),
        compiler_params=pltpu.CompilerParams(dimension_semantics=("parallel",)),
    )(patches_t, w_t)

    # (B, Cout, T*Hout*Wout) -> (B, Cout, T, Hout, Wout): plain reshape, no relayout.
    return out.reshape(b, cout, t, hout, wout)


def _reference(x, routing_weight, weight, *, padding=(1, 1)):
    # Pure-JAX reference following the PyTorch forward semantics.
    b, cin, t, h, w = x.shape
    _, _, cout, _, kh, kw = weight.shape
    xs = x * routing_weight   # routing depends only on (b, cin, t) -> equivalent factoring
    xr = jnp.transpose(xs, (0, 2, 1, 3, 4)).reshape(b * t, cin, h, w)
    wr = weight.reshape(cout, cin, kh, kw)
    out = jax.lax.conv_general_dilated(
        xr, wr, window_strides=(1, 1),
        padding=[(padding[0], padding[0]), (padding[1], padding[1])],
        dimension_numbers=("NCHW", "OIHW", "NCHW"),
        precision=jax.lax.Precision.HIGHEST)
    ho, wo = out.shape[-2:]
    return jnp.transpose(out.reshape(b, t, cout, ho, wo), (0, 2, 1, 3, 4))


if __name__ == "__main__":
    # Module config: in_channels=4, out_channels=8, kernel_size=(1,3,3), padding=(0,1,1),
    # stride=1, dilation=1, groups=1, bias=False, modality='v', num_frames=8.
    B, CIN, COUT, T, H, W = 2, 4, 8, 8, 16, 16
    KH, KW = 3, 3
    key = jax.random.PRNGKey(0)
    kx, kr, kw_ = jax.random.split(key, 3)

    x = jax.random.normal(kx, (B, CIN, T, H, W), dtype=jnp.float32)
    routing = 1.0 + 0.1 * jax.random.normal(kr, (B, CIN, T, 1, 1), dtype=jnp.float32)

    # kaiming_uniform_(a=sqrt(5)) on weight (1,1,COUT,CIN,KH,KW): bound = 1/sqrt(fan_in)
    fan_in = CIN * KH * KW
    bound = 1.0 / math.sqrt(fan_in)
    weight = jax.random.uniform(kw_, (1, 1, COUT, CIN, KH, KW),
                                dtype=jnp.float32, minval=-bound, maxval=bound)
    # bias=False path (the module raises NotImplementedError when bias is present)

    out = tada_conv2d_cinada_v(x, routing, weight, padding=(1, 1))
    out = jax.block_until_ready(out)

    ref = _reference(x, routing, weight, padding=(1, 1))
    assert out.shape == (B, COUT, T, H, W), out.shape
    assert jnp.allclose(out, ref, atol=1e-4, rtol=1e-4), float(jnp.max(jnp.abs(out - ref)))
    print("KERNEL_OK")
</pallas_src>

<mosaic_0001>
module attributes {stable_mosaic.version = 11 : i64} {
  func.func @_tada_kernel(%arg0: i32, %arg1: memref<36x2048xf32, #tpu.memory_space<vmem>>, %arg2: memref<8x36xf32, #tpu.memory_space<vmem>>, %arg3: memref<1x8x2048xf32, #tpu.memory_space<vmem>>) attributes {dimension_semantics = [#tpu.dimension_semantics<parallel>], iteration_bounds = array<i64: 2>, scalar_prefetch = 0 : i64, scratch_operands = 0 : i64, tpu.core_type = #tpu.core_type<tc>, window_params = [{transform_indices = @transform_0, window_bounds = array<i64: 36, 2048>}, {pipeline_mode = #tpu.pipeline_mode<synchronous>, transform_indices = @transform_1, window_bounds = array<i64: 8, 36>}, {transform_indices = @transform_2, window_bounds = array<i64: 1, 8, 2048>}]} {
    %c0 = arith.constant 0 : index
    %c0_0 = arith.constant 0 : index
    %0 = vector.load %arg2[%c0, %c0_0] : memref<8x36xf32, #tpu.memory_space<vmem>>, vector<8x36xf32>
    %c0_1 = arith.constant 0 : index
    %c0_2 = arith.constant 0 : index
    %1 = vector.load %arg1[%c0_1, %c0_2] : memref<36x2048xf32, #tpu.memory_space<vmem>>, vector<36x2048xf32>
    %cst = arith.constant dense<0.000000e+00> : vector<8x2048xf32>
    %2 = tpu.matmul %0, %1, %cst {dimension_numbers = #tpu.dot_dimension_numbers<[1], [0], [0], [1], [0, 0, 1, 1], [], []>, precision = #tpu.contract_precision<fp32>} : vector<8x36xf32>, vector<36x2048xf32>, vector<8x2048xf32> -> vector<8x2048xf32>
    %c0_3 = arith.constant 0 : index
    %c0_4 = arith.constant 0 : index
    %c0_5 = arith.constant 0 : index
    %3 = vector.load %arg3[%c0_3, %c0_4, %c0_5] : memref<1x8x2048xf32, #tpu.memory_space<vmem>>, vector<1x8x2048xf32>
    %4 = vector.shape_cast %3 : vector<1x8x2048xf32> to vector<8x2048xf32>
    %5 = vector.shape_cast %2 : vector<8x2048xf32> to vector<1x8x2048xf32>
    tpu.vector_store %arg3[%c0_3, %c0_4, %c0_5], %5 {strides = array<i32>} : memref<1x8x2048xf32, #tpu.memory_space<vmem>>, vector<1x8x2048xf32>,
    return
  }
  func.func @transform_0(%arg0: i32) -> (i32, i32) {
    %c0_i32 = arith.constant 0 : i32
    %c0_i32_0 = arith.constant 0 : i32
    return %c0_i32, %arg0 : i32, i32
  }
  func.func @transform_1(%arg0: i32) -> (i32, i32) {
    %c0_i32 = arith.constant 0 : i32
    %c0_i32_0 = arith.constant 0 : i32
    %c0_i32_1 = arith.constant 0 : i32
    return %c0_i32, %c0_i32_0 : i32, i32
  }
  func.func @transform_2(%arg0: i32) -> (i32, i32, i32) {
    %c0_i32 = arith.constant 0 : i32
    %c0_i32_0 = arith.constant 0 : i32
    %c0_i32_1 = arith.constant 0 : i32
    return %arg0, %c0_i32, %c0_i32_0 : i32, i32, i32
  }
}

</mosaic_0001>

<bundles_post_ra>
// kernel: tpu_custom_call.1
= control target key start
LH: loop header
LB: loop body
LE: loop exit
PB: predicated region body
PF: predicated region fallthrough
CT: control target
= control target key end

     0   :  { %7 = vsyncpa [#allocation3], 0  ;;  %s7089_s0 = inlined_call_operand.hbm [shape: f32[36,4096], index: 0, kind: input, shape index: {}]   ;;  %s7090_s1 = inlined_call_operand.hbm [shape: f32[8,36], index: 1, kind: input, shape index: {}]   ;;  %s7091_s2 = inlined_call_operand.hbm [shape: f32[2,8,2048], index: 2, kind: output, shape index: {}]  }
   0x1   :  { %9 = vsyncpa [#allocation3 + $0x1], 0 }
   0x2   :  { %10 = vsyncpa [#allocation6], 0 }
   0x3   :  { %11 = vsyncpa [#allocation4], 0 }
   0x4   :  { %13 = vsyncpa [#allocation4 + $0x1], 0  ;;  %s5668_s9 = smov 0   ;;  %s5670_s10 = smov 0  }
   0x5   :  { %s5672_s11 = smov 0   ;;  %s5674_s12 = smov 0  }
   0x6 LB: > { %s5689_s13 = sadd.s32 4294967295, %s5644_s12   ;;  %s4973_s14 = sadd.s32 4294967294, %s5644_s12   ;;  %s5644_s12 = sphi %s5674_s12, %s7249_s12   ;;  %s5640_s11 = sphi %s5672_s11, %s7248_s11   ;;  %s5636_s10 = sphi %s5670_s10, %s7247_s10   ;;  %s5632_s9 = sphi %s5668_s9, %s7246_s9  }
   0x7   : > { %s5693_s15 = sadd.s32 1, %s5644_s12   ;;  %s26_s16 = sadd.s32 1, %s5640_s11 }
   0x8   : > { %s23_s17 = ssub.s32 %s5644_s12, %s5693_s15  ;;  %p33_p0 = scmp.ne.s32.totalorder %s5640_s11, %s5636_s10 }
   0x9   : > { %p24_p1 = scmp.eq.s32.totalorder %s23_s17, 0  ;;  %p34_p2 = scmp.eq.s32.totalorder %s5644_s12, 0 }
   0xa   : > { %p39_p3 = scmp.ne.s32.totalorder %s5636_s10, %s5632_s9  ;;  %p7092_p4 = scmp.eq.s32.totalorder %s5689_s13, 0 }
   0xb   : > { %s5705_s18 = scalar_select %p24_p1, %s5640_s11, %s26_s16  }
   0xc   : > { %p5707_p5 = por %p34_p2, %p33_p0  ;;  %p5713_p6 = por %p7092_p4, %p39_p3 }
   0xd   : > { %p84_p7 = scmp.eq.s32.totalorder %s5689_s13, 1  ;;  %p90_p8 = scmp.eq.s32.totalorder %s4973_s14, 1 }
   0xe   : > { %s7162_s20 = scalar_select %p5713_p6, 1, 0 }
   0xf   : > { %p4974_p9 = scmp.ge.s32.totalorder %s5644_s12, 1  ;;  %p97_p10 = scmp.lt.s32.totalorder %s5644_s12, 3 }
  0x10   : > { %p5720_p11 = por %p84_p7, %p33_p0  ;;  %p5724_p12 = por %p90_p8, %p39_p3 }
  0x11   : > { %p5728_p13 = pnand %p4974_p9, %p97_p10  ;;  %s5646_s24 = smov [#allocation5]  }
  0x12   : > { %s7163_s21 = scalar_select %p5720_p11, 1, 0 }
  0x13   : > { %s7164_s22 = scalar_select %p5724_p12, 1, 0 }
  0x14   : > { %s7165_s23 = scalar_select %p5728_p13, 1, 0 }
  0x15   : > { %p5463_p2 = pneg %p5728_p13  ;;  %s110_s25 = sshll.u32 %s5646_s24, 4  ;;  %s111_s25 = int_to_ptr.vmem [resolvable:$true] %s110_s25 }
  0x16   : > { %p5476_p4 = scmp.lt.s32.totalorder %s5644_s12, 2  ;;  %p7166_p0 = scmp.eq.s32.totalorder %s5689_s13, 0 }
  0x17   : > { %s121_s27 = sand.u32 1, %s5640_s11   ;;  %s5516_s4 = scalar_lea.hbm %s7090_s1, 128 }
  0x18   : > { %p5738_p7 = pnand %p5463_p2, %p7166_p0  ;;  %p5745_p3 = pnand %p5476_p4, %p5707_p5 }
  0x19   : > { %s5453_s29 = smul.u32 640, %s121_s27  ;;  %p5517_p8 = scmp.ne.s32.totalorder %s7090_s1, %s5516_s4 }
  0x1a   : > { %s7168_s28 = scalar_select %p5745_p3, 1, 0 }
  0x1b   : > { %p5518_p9 = pneg %p5738_p7  ;;  %p5523_p4 = scmp.lt.u32.totalorder %s5516_s4, %s7090_s1 }
  0x1d   : > { %p5519_p10 = pnand %p5518_p9, %p5517_p8 }
  0x1f   : > { %p5520_p2 = pneg %p5519_p10 }
  0x21   : > { %p5525_p5 = pnand %p5523_p4, %p5520_p2 }
  0x23   : > { %5528 = shalt.err (!%p5525_p5)
}
  0x24   : > { %s5529_s14 = scalar_lea.vmem %s111_s25, 128  ;;  %p5537_p11 = scmp.lt.s32.totalorder %s111_s25, %s111_s25 }
  0x25   : > { %p5530_p0 = scmp.ne.s32.totalorder %s111_s25, %s5529_s14  ;;  %p5538_p6 = scmp.lt.s32.totalorder %s5529_s14, %s5529_s14 }
  0x27   : > { %p5532_p1 = pnand %p5530_p0, %p5518_p9  ;;  %p5539_p13 = por %p5538_p6, %p5537_p11 }
  0x29   : > { %p5533_p12 = pneg %p5532_p1 }
  0x2b   : > { %p5540_p3 = pnand %p5539_p13, %p5533_p12 }
  0x2d   : > { %5543 = shalt.err (!%p5540_p3)
}
  0x2e   : > { %5466 = dma.hbm_to_vmem [thread:$0]  (!%p5738_p7), %s7090_s1, 128, %s111_s25, [#allocation6]  }
  0x2f   : > { %s4987_s19 = sshll.u32 %s5644_s12, 11  ;;  %s125_s24 = scalar_lea.vmem [#allocation2], %s5453_s29 }
  0x30   : > { %s132_s30 = sshll.u32 %s125_s24, 4  ;;  %s5769_s5 = scalar_lea.hbm %s7089_s0, %s4987_s19  ;;  %s5771_s30 = int_to_ptr.vmem [resolvable:$true] %s132_s30 }
  0x31   : > { %s5773_s26 = scalar_lea.sflag [#allocation3], %s121_s27  ;;  %s5544_s6 = scalar_lea.hbm %s5769_s5, 10240 }
  0x32   : > { %p5545_p6 = scmp.ne.s32.totalorder %s5769_s5, %s5544_s6  ;;  %p7169_p11 = scmp.ne.s32.totalorder %s7168_s28, 0 }
  0x33   : > { %s5549_s7 = scalar_lea.hbm %s7089_s0, 20480  ;;  %p5550_p7 = scmp.lt.u32.totalorder %s5769_s5, %s7089_s0 }
  0x34   : > { %p5546_p12 = pneg %p7169_p11  ;;  %p5551_p3 = scmp.lt.u32.totalorder %s5549_s7, %s5544_s6 }
  0x35   : > { %p5553_p9 = scmp.lt.u32.totalorder %s5544_s6, %s5769_s5 }
  0x36   : > { %p5547_p13 = pnand %p5546_p12, %p5545_p6  ;;  %p5552_p8 = por %p5551_p3, %p5550_p7 }
  0x38   : > { %p5548_p1 = pneg %p5547_p13  ;;  %p5554_p10 = por %p5553_p9, %p5552_p8 }
  0x3a   : > { %p5555_p2 = pnand %p5554_p10, %p5548_p1 }
  0x3c   : > { %5558 = shalt.err (!%p5555_p2)
}
  0x3d   : > { %s5559_s27 = scalar_lea.vmem %s5771_s30, 10240  ;;  %s5647_s16 = smov [#allocation2]  }
  0x3e   : > { %p5560_p4 = scmp.ne.s32.totalorder %s5771_s30, %s5559_s27  ;;  %s5564_s17 = sshll.u32 %s5647_s16, 4  ;;  %s5565_s17 = int_to_ptr.vmem [resolvable:$false] %s5564_s17 }
  0x3f   : > { %s5566_s19 = scalar_lea.vmem %s5565_s17, 20480  ;;  %p5567_p6 = scmp.lt.s32.totalorder %s5771_s30, %s5565_s17 }
  0x40   : > { %p5562_p5 = pnand %p5560_p4, %p5546_p12  ;;  %p5568_p13 = scmp.lt.s32.totalorder %s5566_s19, %s5559_s27 }
  0x42   : > { %p5563_p0 = pneg %p5562_p5  ;;  %p5569_p7 = por %p5568_p13, %p5567_p6 }
  0x44   : > { %p5570_p3 = pnand %p5569_p7, %p5563_p0 }
  0x46   : > { %5573 = shalt.err (!%p5570_p3)
}
  0x47   : > { %s5648_s24 = smov 4096   ;;  %s5649_s3 = smov 2048  }
  0x48   : > { %s5650_s4 = smov 128   ;;  %p7170_p12 = scmp.ne.s32.totalorder %s7165_s23, 0 }
  0x49   : > { %5470 = dma.hbm_to_vmem [thread:$0]  (!%p7169_p11), %s5769_s5, 10240, %s5771_s30, %s5773_s26, %s5648_s24, %s5649_s3, %s5650_s4  }
  0x4a   : > { %144 = sbr.rel (%p7170_p12) target bundleno = 597 (0x255), region = 28 }
  0x51   : > { %s5804_s6 = sand.u32 1, %s5636_s10   ;;  %p7171_p1 = scmp.ne.s32.totalorder %s7162_s20, 0 }
  0x52   : > { %s5454_s25 = smul.u32 640, %s5804_s6  ;;  %s147_s29 = scalar_lea.sflag [#allocation3], %s5804_s6 }
  0x54   : > { %s5808_s7 = scalar_lea.vmem [#allocation2], %s5454_s25 }
  0x55   : > { %5619 = dma.done.wait (%p7171_p1), %s147_s29, 10240  }
  0x56   : > { %5621 = vsyncadd (%p7171_p1), %s147_s29, 4294957056  ;;  %p7172_p11 = scmp.eq.s32.totalorder %s5689_s13, 0 }
  0x58   : > { %5623 = dma.done.wait (%p7172_p11), [#allocation6], 128   ;;  %p7173_p8 = pmov %p7172_p11 }
  0x59   : > { %v7118_v0 = vmov 0.0   ;;  %v178_v1 = vld [vmem:[%s5808_s7 + $0x8] sm:$0xff]  ;;  %v180_v3 = vld [vmem:[%s5808_s7 + $0x18] sm:$0xff]  ;;  %vm261_vm0 = vcmask 1043456   ;;  %v177_v8 = vld [vmem:[%s5808_s7] sm:$0xff]  ;;  %vm257_vm1 = vcmask 293888  }
  0x5a   : > { %5625 = vsyncadd (%p7173_p8), [#allocation6], 4294967168  ;;  %384 = vmatprep.mubr.f32.mxu0 %v7118_v0  ;;  %953 = vmatprep.mubr.f32.mxu1 %v7118_v0  ;;  %v194_v2 = vld [vmem:[%s5808_s7 + $0x88] sm:$0xff]  ;;  %v310_v4 = vand.u32 4294901760, %v178_v1  ;;  %v196_v6 = vld [vmem:[%s5808_s7 + $0x98] sm:$0xff]  ;;  %v879_v7 = vand.u32 4294901760, %v180_v3 }
  0x5b   : > { %v314_v5 = vand.u32 4294901760, %v194_v2  ;;  %v193_v9 = vld [vmem:[%s5808_s7 + $0x80] sm:$0xff]  ;;  %v883_v10 = vand.u32 4294901760, %v196_v6  ;;  %v312_v11 = vand.u32 4294901760, %v177_v8  ;;  %v179_v13 = vld [vmem:[%s5808_s7 + $0x10] sm:$0xff]  ;;  %v210_v15 = vld [vmem:[%s5808_s7 + $0x108] sm:$0xff] }
  0x5c   : > { %v316_v12 = vand.u32 4294901760, %v193_v9  ;;  %v195_v14 = vld [vmem:[%s5808_s7 + $0x90] sm:$0xff]  ;;  %v5831_v17 = vsub.f32 %v178_v1, %v310_v4  ;;  %v5835_v19 = vsub.f32 %v180_v3, %v879_v7  ;;  %v226_v20 = vld [vmem:[%s5808_s7 + $0x188] sm:$0xff]  ;;  %v212_v21 = vld [vmem:[%s5808_s7 + $0x118] sm:$0xff]  ;;  %v881_v29 = vand.u32 4294901760, %v179_v13  ;;  %s4981_s20 = sshll.u32 %s5804_s6, 7 }
  0x5d   : > { %v5829_v16 = vpack.c.bf16 %v314_v5, %v310_v4  ;;  %v5833_v18 = vsub.f32 %v194_v2, %v314_v5  ;;  %v228_v22 = vld [vmem:[%s5808_s7 + $0x198] sm:$0xff]  ;;  %v5840_v23 = vpack.c.bf16 %v883_v10, %v879_v7  ;;  %v5842_v24 = vsub.f32 %v196_v6, %v883_v10  ;;  %v209_v27 = vld [vmem:[%s5808_s7 + $0x100] sm:$0xff]  ;;  %v211_v37 = vld [vmem:[%s5808_s7 + $0x110] sm:$0xff]  ;;  %s7022_s23 = scalar_lea.vmem [#allocation7], %s4981_s20  ;;  %s4988_s28 = sshll.u32 %s5689_s13, 11 }
  0x5e   : > { %v5844_v25 = vpack.c.bf16 %v316_v12, %v312_v11  ;;  %v5846_v26 = vsub.f32 %v177_v8, %v312_v11  ;;  %v5850_v28 = vsub.f32 %v193_v9, %v316_v12  ;;  %v885_v30 = vand.u32 4294901760, %v195_v14  ;;  %v225_v32 = vld [vmem:[%s5808_s7 + $0x180] sm:$0xff]  ;;  %v227_v38 = vld [vmem:[%s5808_s7 + $0x190] sm:$0xff]  ;;  %v242_v43 = vld [vmem:[%s5808_s7 + $0x208] sm:$0xf]  ;;  %s4893_s30 = sshll.u32 %s7022_s23, 4  ;;  %s7042_s8 = scalar_lea.hbm %s7091_s2, %s4988_s28  ;;  %s7044_s30 = int_to_ptr.vmem [resolvable:$true] %s4893_s30 }
  0x5f   : > { %4990 = vmatprep.subr.bf16.mxu0 %v5829_v16  ;;  %v318_v31 = vand.u32 4294901760, %v210_v15  ;;  %5038 = vmatprep.subr.bf16.mxu1 %v5840_v23  ;;  %v322_v33 = vand.u32 4294901760, %v226_v20  ;;  %v887_v34 = vand.u32 4294901760, %v212_v21  ;;  %v891_v35 = vand.u32 4294901760, %v228_v22  ;;  %v244_v44 = vld [vmem:[%s5808_s7 + $0x218] sm:$0xf] }
  0x60   : > { %4992 = vmatpush1.bf16.msra.mxu0 %v5844_v25  ;;  %v320_v36 = vand.u32 4294901760, %v209_v27  ;;  %v5857_v39 = vpack.c.bf16 %v885_v30, %v881_v29  ;;  %v5859_v40 = vsub.f32 %v179_v13, %v881_v29  ;;  %v5861_v41 = vsub.f32 %v195_v14, %v885_v30  ;;  %v241_v45 = vld [vmem:[%s5808_s7 + $0x200] sm:$0xf]  ;;  %v243_v58 = vld [vmem:[%s5808_s7 + $0x210] sm:$0xf]  ;;  %s4879_s13 = scalar_lea.sflag [#allocation4], %s5804_s6 }
  0x61   : > { %v5863_v42 = vsub.f32 %v210_v15, %v318_v31  ;;  %v5868_v46 = vpack.c.bf16 %v322_v33, %v318_v31  ;;  %v5870_v47 = vsub.f32 %v226_v20, %v322_v33  ;;  %v5872_v48 = vpack.c.bf16 %v891_v35, %v887_v34  ;;  %v176_v63 = vld [vmem:[#allocation5] sm:$0xff]  ;;  %s5574_s14 = scalar_lea.vmem %s7044_s30, 2048  ;;  %p7243_p10 = scmp.ne.s32.totalorder %s7163_s21, 0 }
  0x62   : > { %v5874_v49 = vsub.f32 %v212_v21, %v887_v34  ;;  %5040 = vmatpush1.bf16.msra.mxu1 %v5857_v39  ;;  %v5877_v50 = vsub.f32 %v228_v22, %v891_v35  ;;  %v324_v51 = vand.u32 4294901760, %v225_v32  ;;  %v5879_v52 = vsub.f32 %v209_v27, %v320_v36  ;;  %p5575_p9 = scmp.ne.s32.totalorder %s7044_s30, %s5574_s14  ;;  %s5652_s27 = smov [#allocation7]  }
  0x63   : > { %v889_v53 = vand.u32 4294901760, %v211_v37  ;;  %4994 = vmatprep.subr.bf16.mxu0 %v5868_v46  ;;  %5042 = vmatprep.subr.bf16.mxu1 %v5872_v48  ;;  %v893_v54 = vand.u32 4294901760, %v227_v38  ;;  %v5884_v55 = vsel %vm261_vm0, %v242_v43, 0  ;;  %v5887_v56 = vsel %vm261_vm0, %v244_v44, 0  ;;  %s5578_s16 = sshll.u32 %s5652_s27, 4  ;;  %s5579_s16 = int_to_ptr.vmem [resolvable:$false] %s5578_s16 }
  0x64   : > { %v263_v57 = vsel %vm261_vm0, %v241_v45, 0  ;;  %v5891_v59 = vpack.c.bf16 %v324_v51, %v320_v36  ;;  %v5893_v60 = vsub.f32 %v225_v32, %v324_v51  ;;  %v5898_v62 = vand.u32 4294901760, %v5884_v55  ;;  %p5576_p2 = pnand %p5575_p9, %p7243_p10  ;;  %s5580_s17 = scalar_lea.vmem %s5579_s16, 4096 }
  0x65   : > { %v5895_v61 = vsub.f32 %v211_v37, %v889_v53  ;;  %v5900_v1 = vpack.c.bf16 %v893_v54, %v889_v53  ;;  %v5902_v2 = vsub.f32 %v227_v38, %v893_v54  ;;  %v5905_v3 = vand.u32 4294901760, %v5887_v56  ;;  %p5581_p5 = scmp.lt.s32.totalorder %s7044_s30, %s5579_s16  ;;  %p5582_p0 = scmp.lt.s32.totalorder %s5580_s17, %s5574_s14 }
  0x66   : > { %v5907_v4 = vand.u32 4294901760, %v263_v57  ;;  %4996 = vmatpush1.bf16.msra.mxu0 %v5891_v59  ;;  %v269_v5 = vsel %vm261_vm0, %v243_v58, 0  ;;  %v398_v6 = vand.u32 4294901760, %v5831_v17  ;;  %v410_v7 = vand.u32 4294901760, %v5833_v18  ;;  %p5577_p4 = pneg %p5576_p2 }
  0x67   : > { %v967_v8 = vand.u32 4294901760, %v5835_v19  ;;  %5044 = vmatpush1.bf16.msra.mxu1 %v5900_v1  ;;  %327 = vmatprep.subr.mxu0 %v5898_v62  ;;  %v5919_v10 = vand.u32 4294901760, %v269_v5  ;;  %v979_v11 = vand.u32 4294901760, %v5842_v24  ;;  %v259_v12 = vsel %vm257_vm1, %v176_v63, 0  ;;  %p5583_p6 = por %p5582_p0, %p5581_p5 }
  0x68   : > { %v5917_v9 = vsub.f32 %v263_v57, %v5907_v4  ;;  %896 = vmatprep.subr.mxu1 %v5905_v3  ;;  %v399_v13 = vsub.f32 %v5831_v17, %v398_v6  ;;  %v411_v14 = vsub.f32 %v5833_v18, %v410_v7  ;;  %v5933_v20 = vand.u32 4294901760, %v259_v12 }
  0x69   : > { %v968_v15 = vsub.f32 %v5835_v19, %v967_v8  ;;  %v5936_v21 = vsub.f32 %v269_v5, %v5919_v10  ;;  %v980_v22 = vsub.f32 %v5842_v24, %v979_v11  ;;  %v404_v27 = vand.u32 4294901760, %v5846_v26  ;;  %p5584_p13 = pnand %p5583_p6, %p5577_p4 }
  0x6a   : > { %v416_v29 = vand.u32 4294901760, %v5850_v28  ;;  %329 = vmatpush1.msra.mxu0 %v5907_v4  ;;  %v400_v30 = vand.u32 4294901760, %v399_v13  ;;  %v412_v31 = vand.u32 4294901760, %v411_v14  ;;  %v5945_v33 = vsub.f32 %v259_v12, %v5933_v20 }
  0x6b   : > { %v969_v32 = vand.u32 4294901760, %v968_v15  ;;  %898 = vmatpush1.msra.mxu1 %v5919_v10  ;;  %v981_v34 = vand.u32 4294901760, %v980_v22  ;;  %v405_v35 = vsub.f32 %v5846_v26, %v404_v27  ;;  %v973_v37 = vand.u32 4294901760, %v5859_v40 }
  0x6c   : > { %v417_v36 = vsub.f32 %v5850_v28, %v416_v29  ;;  %v4997_v38 = vpack.c.bf16 %v412_v31, %v400_v30  ;;  %v5956_v43 = vand.u32 4294901760, %v5945_v33  ;;  %v985_v44 = vand.u32 4294901760, %v5861_v41 }
  0x6d   : > { %v422_v45 = vand.u32 4294901760, %v5863_v42  ;;  %v5045_v51 = vpack.c.bf16 %v981_v34, %v969_v32  ;;  %v406_v53 = vand.u32 4294901760, %v405_v35  ;;  %v974_v57 = vsub.f32 %v5859_v40, %v973_v37 }
  0x6e   : > { %7174 = vst [vmem:[#allocation11_spill] sm:$0xff] %v5956_v43  ;;  %v418_v54 = vand.u32 4294901760, %v417_v36  ;;  %4998 = vmatprep.subr.bf16.mxu0 %v4997_v38  ;;  %v388_v58 = vsub.f32 %v5945_v33, %v5956_v43  ;;  %v986_v63 = vsub.f32 %v5861_v41, %v985_v44  ;;  %v434_v12 = vand.u32 4294901760, %v5870_v47 }
  0x6f   : > { %v423_v5 = vsub.f32 %v5863_v42, %v422_v45  ;;  %5046 = vmatprep.subr.bf16.mxu1 %v5045_v51  ;;  %v975_v14 = vand.u32 4294901760, %v974_v57  ;;  %v7098_v15 = vand.u32 4294901760, %v5874_v49  ;;  %v7097_v22 = vand.u32 4294901760, %v5877_v50 }
  0x70   : > { %v4999_v13 = vpack.c.bf16 %v418_v54, %v406_v53  ;;  %v5974_v30 = vand.u32 4294901760, %v388_v58  ;;  %v987_v31 = vand.u32 4294901760, %v986_v63  ;;  %v435_v34 = vsub.f32 %v5870_v47, %v434_v12 }
  0x71   : > { %v424_v32 = vand.u32 4294901760, %v423_v5  ;;  %v992_v35 = vsub.f32 %v5874_v49, %v7098_v15  ;;  %v1004_v36 = vsub.f32 %v5877_v50, %v7097_v22  ;;  %v7099_v38 = vand.u32 4294901760, %v5879_v52 }
  0x72   : > { %v7100_v51 = vand.u32 4294901760, %v5893_v60  ;;  %390 = vmatmul.mubr.f32.vlgmr.msra.gmra.mrb[0].mxu0 %v5974_v30  ;;  %959 = vmatmul.mubr.f32.vlgmr.msra.gmra.mrb[0].mxu1 %v5974_v30  ;;  %v5047_v53 = vpack.c.bf16 %v987_v31, %v975_v14  ;;  %v436_v54 = vand.u32 4294901760, %v435_v34  ;;  %v7102_v57 = vand.u32 4294901760, %v5895_v61 }
  0x73   : > { %v7101_v58 = vand.u32 4294901760, %v5902_v2  ;;  %5000 = vmatpush1.bf16.msra.mxu0 %v4999_v13  ;;  %v993_v63 = vand.u32 4294901760, %v992_v35  ;;  %v1005_v5 = vand.u32 4294901760, %v1004_v36  ;;  %v429_v22 = vsub.f32 %v5879_v52, %v7099_v38  ;;  %510 = vmatprep.mubr.f32.mxu0 %v7118_v0 }
  0x74   : > { %v441_v15 = vsub.f32 %v5893_v60, %v7100_v51  ;;  %5048 = vmatpush1.bf16.msra.mxu1 %v5047_v53  ;;  %v5001_v14 = vpack.c.bf16 %v436_v54, %v424_v32  ;;  %v998_v31 = vsub.f32 %v5895_v61, %v7102_v57  ;;  %v6006_v34 = vsub.f32 %v5884_v55, %v5898_v62 }
  0x75   : > { %v1010_v13 = vsub.f32 %v5902_v2, %v7101_v58  ;;  %v5049_v35 = vpack.c.bf16 %v1005_v5, %v993_v63  ;;  %v430_v36 = vand.u32 4294901760, %v429_v22  ;;  %v6010_v51 = vsub.f32 %v5887_v56, %v5905_v3  ;;  %1079 = vmatprep.mubr.f32.mxu1 %v7118_v0 }
  0x76   : > { %v442_v38 = vand.u32 4294901760, %v441_v15  ;;  %5002 = vmatprep.subr.bf16.mxu0 %v5001_v14  ;;  %v999_v32 = vand.u32 4294901760, %v998_v31  ;;  %v446_v54 = vand.u32 4294901760, %v6006_v34  ;;  %v452_v58 = vand.u32 4294901760, %v5917_v9 }
  0x77   : > { %v1011_v53 = vand.u32 4294901760, %v1010_v13  ;;  %5050 = vmatprep.subr.bf16.mxu1 %v5049_v35  ;;  %v1015_v55 = vand.u32 4294901760, %v6010_v51  ;;  %v1021_v22 = vand.u32 4294901760, %v5936_v21  ;;  %v5005_v13 = vpack.c.bf16 %v5833_v18, %v5831_v17 }
  0x78   : > { %v5003_v57 = vpack.c.bf16 %v442_v38, %v430_v36  ;;  %v447_v56 = vsub.f32 %v6006_v34, %v446_v54  ;;  %v453_v63 = vsub.f32 %v5917_v9, %v452_v58  ;;  %v5071_v17 = vpack.c.bf16 %v985_v44, %v973_v37 }
  0x79   : > { %v5051_v15 = vpack.c.bf16 %v1011_v53, %v999_v32  ;;  %v1016_v5 = vsub.f32 %v6010_v51, %v1015_v55  ;;  %v1022_v38 = vsub.f32 %v5936_v21, %v1021_v22  ;;  %v5053_v32 = vpack.c.bf16 %v5842_v24, %v5835_v19  ;;  %v182_v19 = vld [vmem:[%s5808_s7 + $0x28] sm:$0xff] }
  0x7a   : > { %5004 = vmatpush1.bf16.msra.mxu0 %v5003_v57  ;;  %v448_v14 = vand.u32 4294901760, %v447_v56  ;;  %v454_v31 = vand.u32 4294901760, %v453_v63  ;;  %v5007_v57 = vpack.c.bf16 %v5850_v28, %v5846_v26  ;;  %v5055_v53 = vpack.c.bf16 %v5861_v41, %v5859_v40  ;;  %v198_v40 = vld [vmem:[%s5808_s7 + $0xa8] sm:$0xff]  ;;  %v200_v41 = vld [vmem:[%s5808_s7 + $0xb8] sm:$0xff] }
  0x7b   : > { %5052 = vmatpush1.bf16.msra.mxu1 %v5051_v15  ;;  %v1017_v35 = vand.u32 4294901760, %v1016_v5  ;;  %v1023_v36 = vand.u32 4294901760, %v1022_v38  ;;  %v5009_v15 = vpack.c.bf16 %v5870_v47, %v5863_v42  ;;  %v5057_v56 = vpack.c.bf16 %v5877_v50, %v5874_v49 }
  0x7c   : > { %449 = vmatprep.subr.mxu0 %v448_v14  ;;  %v5011_v63 = vpack.c.bf16 %v5893_v60, %v5879_v52  ;;  %v5059_v5 = vpack.c.bf16 %v5902_v2, %v5895_v61  ;;  %v5021_v38 = vpack.c.bf16 %v410_v7, %v398_v6  ;;  %v5069_v14 = vpack.c.bf16 %v979_v11, %v967_v8  ;;  %v184_v6 = vld [vmem:[%s5808_s7 + $0x38] sm:$0xff]  ;;  %v197_v8 = vld [vmem:[%s5808_s7 + $0xa0] sm:$0xff] }
  0x7d   : > { %1018 = vmatprep.subr.mxu1 %v1017_v35  ;;  %v5025_v18 = vpack.c.bf16 %v434_v12, %v422_v45  ;;  %v7175_v24 = vand.u32 4294901760, %v5874_v49  ;;  %v7176_v26 = vand.u32 4294901760, %v5877_v50  ;;  %v7177_v42 = vand.u32 4294901760, %v5879_v52  ;;  %v181_v50 = vld [vmem:[%s5808_s7 + $0x20] sm:$0xff]  ;;  %v183_v45 = vld [vmem:[%s5808_s7 + $0x30] sm:$0xff]  ;;  %v230_v35 = vld [vmem:[%s5808_s7 + $0x1a8] sm:$0xff] }
  0x7e   : > { %455 = vmatpush1.msra.mxu0 %v454_v31  ;;  %v5023_v31 = vpack.c.bf16 %v416_v29, %v404_v27  ;;  %v7178_v47 = vand.u32 4294901760, %v5893_v60  ;;  %v1448_v49 = vand.u32 4294901760, %v182_v19  ;;  %v7179_v11 = vand.u32 4294901760, %v5895_v61  ;;  %v199_v60 = vld [vmem:[%s5808_s7 + $0xb0] sm:$0xff]  ;;  %v214_v61 = vld [vmem:[%s5808_s7 + $0x128] sm:$0xff] }
  0x7f   : > { %1024 = vmatpush1.msra.mxu1 %v1023_v36  ;;  %5006 = vmatprep.subr.bf16.mxu0 %v5005_v13  ;;  %v5073_v28 = vpack.c.bf16 %v7176_v26, %v7175_v24  ;;  %v7180_v27 = vand.u32 4294901760, %v5902_v2  ;;  %v1452_v37 = vand.u32 4294901760, %v198_v40  ;;  %v2017_v44 = vand.u32 4294901760, %v184_v6 }
  0x80   : > { %5054 = vmatprep.subr.bf16.mxu1 %v5053_v32  ;;  %512 = vmatmul.mubr.f32.vlgmr.msra.gmra.mrb[0].mxu0 %v5933_v20  ;;  %v5027_v7 = vpack.c.bf16 %v7178_v47, %v7177_v42  ;;  %v2021_v52 = vand.u32 4294901760, %v200_v41  ;;  %v1450_v12 = vand.u32 4294901760, %v181_v50  ;;  %v1454_v13 = vand.u32 4294901760, %v197_v8 }
  0x81   : > { %5008 = vmatpush1.bf16.msra.mxu0 %v5007_v57  ;;  %1081 = vmatmul.mubr.f32.vlgmr.msra.gmra.mrb[0].mxu1 %v5933_v20  ;;  %v5075_v29 = vpack.c.bf16 %v7180_v27, %v7179_v11  ;;  %v6115_v2 = vsub.f32 %v182_v19, %v1448_v49  ;;  %v2019_v36 = vand.u32 4294901760, %v183_v45  ;;  %v2023_v32 = vand.u32 4294901760, %v199_v60  ;;  %v216_v57 = vld [vmem:[%s5808_s7 + $0x138] sm:$0xff]  ;;  %v215_v19 = vld [vmem:[%s5808_s7 + $0x130] sm:$0xff] }
  0x82   : > { %5056 = vmatpush1.bf16.msra.mxu1 %v5055_v53  ;;  %5010 = vmatprep.subr.bf16.mxu0 %v5009_v15  ;;  %v232_v53 = vld [vmem:[%s5808_s7 + $0x1b8] sm:$0xff]  ;;  %v6121_v15 = vpack.c.bf16 %v1452_v37, %v1448_v49  ;;  %v6139_v24 = vsub.f32 %v181_v50, %v1450_v12  ;;  %v2025_v26 = vand.u32 4294901760, %v216_v57  ;;  %v2027_v47 = vand.u32 4294901760, %v215_v19 }
  0x83   : > { %5058 = vmatprep.subr.bf16.mxu1 %v5057_v56  ;;  %602 = vmatprep.mubr.f32.mxu0 %v7118_v0  ;;  %v6123_v56 = vsub.f32 %v198_v40, %v1452_v37  ;;  %v6152_v42 = vsub.f32 %v199_v60, %v2023_v32  ;;  %v248_v11 = vld [vmem:[%s5808_s7 + $0x238] sm:$0xf] }
  0x84   : > { %1171 = vmatprep.mubr.f32.mxu1 %v7118_v0 }
  0x85   : > { %5012 = vmatpush1.bf16.msra.mxu0 %v5011_v63  ;;  %v6125_v63 = vpack.c.bf16 %v2021_v52, %v2017_v44 }
  0x86   : > { %5060 = vmatpush1.bf16.msra.mxu1 %v5059_v5  ;;  %544 = vmatprep.subr.mxu0 %v6006_v34  ;;  %v213_v5 = vld [vmem:[%s5808_s7 + $0x120] sm:$0xff]  ;;  %v231_v34 = vld [vmem:[%s5808_s7 + $0x1b0] sm:$0xff] }
  0x87   : > { %1113 = vmatprep.subr.mxu1 %v6010_v51  ;;  %v6143_v51 = vsub.f32 %v197_v8, %v1454_v13  ;;  %v1458_v40 = vand.u32 4294901760, %v213_v5  ;;  %v6169_v8 = vsub.f32 %v216_v57, %v2025_v26 }
  0x89   : > { %547 = vmatpush1.msra.mxu0 %v5917_v9  ;;  %v2031_v9 = vand.u32 4294901760, %v231_v34 }
  0x8a   : > { %1116 = vmatpush1.msra.mxu1 %v5936_v21  ;;  %5014 = vmatprep.subr.bf16.mxu0 %v5829_v16 }
  0x8b   : > { %5062 = vmatprep.subr.bf16.mxu1 %v5840_v23  ;;  %605 = vmatmul.mubr.f32.vlgmr.msra.gmra.mrb[0].mxu0 %v5945_v33  ;;  %v6193_v60 = vsub.f32 %v231_v34, %v2031_v9 }
  0x8c   : > { %5016 = vmatpush1.bf16.msra.mxu0 %v5844_v25  ;;  %1174 = vmatmul.mubr.f32.vlgmr.msra.gmra.mrb[0].mxu1 %v5945_v33 }
  0x8d   : > { %5064 = vmatpush1.bf16.msra.mxu1 %v5857_v39  ;;  %5018 = vmatprep.subr.bf16.mxu0 %v5868_v46 }
  0x8e   : > { %5066 = vmatprep.subr.bf16.mxu1 %v5872_v48  ;;  %685 = vmatprep.mubr.f32.mxu0 %v7118_v0 }
  0x8f   : > { %1254 = vmatprep.mubr.f32.mxu1 %v7118_v0 }
  0x90   : > { %5020 = vmatpush1.bf16.msra.mxu0 %v5891_v59 }
  0x91   : > { %5068 = vmatpush1.bf16.msra.mxu1 %v5900_v1  ;;  %628 = vmatprep.subr.mxu0 %v5898_v62 }
  0x92   : > { %1197 = vmatprep.subr.mxu1 %v5905_v3 }
  0x94   : > { %630 = vmatpush1.msra.mxu0 %v5907_v4 }
  0x95   : > { %1199 = vmatpush1.msra.mxu1 %v5919_v10  ;;  %5022 = vmatprep.subr.bf16.mxu0 %v5021_v38  ;;  %v229_v38 = vld [vmem:[%s5808_s7 + $0x1a0] sm:$0xff] }
  0x96   : > { %5070 = vmatprep.subr.bf16.mxu1 %v5069_v14  ;;  %689 = vmatmul.mubr.f32.vlgmr.msra.gmra.mrb[0].mxu0 %v5956_v43  ;;  %v6131_v14 = vsub.f32 %v184_v6, %v2017_v44  ;;  %v1462_v6 = vand.u32 4294901760, %v229_v38  ;;  %v7116_v44 = vand.u32 4294901760, %v6123_v56 }
  0x97   : > { %5024 = vmatpush1.bf16.msra.mxu0 %v5023_v31  ;;  %1258 = vmatmul.mubr.f32.vlgmr.msra.gmra.mrb[0].mxu1 %v5956_v43  ;;  %v6133_v31 = vsub.f32 %v200_v41, %v2021_v52  ;;  %v6150_v41 = vsub.f32 %v183_v45, %v2019_v36  ;;  %v6187_v45 = vpack.c.bf16 %v2031_v9, %v2027_v47 }
  0x98   : > { %5072 = vmatpush1.bf16.msra.mxu1 %v5071_v17  ;;  %5026 = vmatprep.subr.bf16.mxu0 %v5025_v18  ;;  %v1456_v17 = vand.u32 4294901760, %v214_v61  ;;  %v1460_v18 = vand.u32 4294901760, %v230_v35  ;;  %v6176_v27 = vpack.c.bf16 %v1462_v6, %v1458_v40  ;;  %v6185_v52 = vsub.f32 %v229_v38, %v1462_v6 }
  0x99   : > { %5074 = vmatprep.subr.bf16.mxu1 %v5073_v28  ;;  %789 = vmatprep.mubr.f32.mxu0 %v7118_v0  ;;  %v2029_v28 = vand.u32 4294901760, %v232_v53  ;;  %v1549_v57 = vsub.f32 %v6123_v56, %v7116_v44 }
  0x9a   : > { %1358 = vmatprep.mubr.f32.mxu1 %v7118_v0  ;;  %v6159_v49 = vsub.f32 %v214_v61, %v1456_v17  ;;  %v6161_v21 = vsub.f32 %v230_v35, %v1460_v18 }
  0x9b   : > { %5028 = vmatpush1.bf16.msra.mxu0 %v5027_v7  ;;  %v6157_v7 = vpack.c.bf16 %v1460_v18, %v1456_v17  ;;  %v6167_v50 = vpack.c.bf16 %v2029_v28, %v2025_v26 }
  0x9c   : > { %5076 = vmatpush1.bf16.msra.mxu1 %v5075_v29  ;;  %730 = vmatprep.subr.mxu0 %v446_v54  ;;  %v6137_v54 = vpack.c.bf16 %v1454_v13, %v1450_v12  ;;  %v6178_v29 = vsub.f32 %v213_v5, %v1458_v40  ;;  %v284_v12 = vsel %vm261_vm0, %v248_v11, 0  ;;  %v7110_v13 = vand.u32 4294901760, %v6131_v14 }
  0x9d   : > { %1299 = vmatprep.subr.mxu1 %v1015_v55  ;;  %v6145_v55 = vpack.c.bf16 %v2023_v32, %v2019_v36  ;;  %v7109_v36 = vand.u32 4294901760, %v6133_v31  ;;  %v7108_v32 = vand.u32 4294901760, %v6139_v24  ;;  %v7103_v5 = vand.u32 4294901760, %v6152_v42 }
  0x9e   : > { %v6219_v17 = vand.u32 4294901760, %v284_v12  ;;  %v2106_v26 = vsub.f32 %v6131_v14, %v7110_v13  ;;  %v7111_v40 = vand.u32 4294901760, %v6169_v8  ;;  %v7114_v11 = vand.u32 4294901760, %v6178_v29 }
  0x9f   : > { %734 = vmatpush1.msra.mxu0 %v452_v58  ;;  %v245_v58 = vld [vmem:[%s5808_s7 + $0x220] sm:$0xf] }
  0xa0   : > { %1303 = vmatpush1.msra.mxu1 %v1021_v22  ;;  %5030 = vmatprep.subr.bf16.mxu0 %v5829_v16  ;;  %v246_v16 = vld [vmem:[%s5808_s7 + $0x228] sm:$0xf]  ;;  %v7117_v22 = vand.u32 4294901760, %v6115_v2  ;;  %v275_v37 = vsel %vm261_vm0, %v245_v58, 0  ;;  %v2124_v58 = vsub.f32 %v6152_v42, %v7103_v5 }
  0xa1   : > { %5078 = vmatprep.subr.bf16.mxu1 %v5840_v23  ;;  %791 = vmatmul.mubr.f32.vlgmr.msra.gmra.mrb[0].mxu0 %v5933_v20  ;;  %v6171_v23 = vsub.f32 %v232_v53, %v2029_v28  ;;  %v6203_v61 = vand.u32 4294901760, %v275_v37  ;;  %v7107_v53 = vand.u32 4294901760, %v6143_v51  ;;  %v1543_v28 = vsub.f32 %v6139_v24, %v7108_v32 }
  0xa2   : > { %5032 = vmatpush1.bf16.msra.mxu0 %v5844_v25  ;;  %1360 = vmatmul.mubr.f32.vlgmr.msra.gmra.mrb[0].mxu1 %v5933_v20  ;;  %v247_v25 = vld [vmem:[%s5808_s7 + $0x230] sm:$0xf] }
  0xa3   : > { %5080 = vmatpush1.bf16.msra.mxu1 %v5857_v39  ;;  %5034 = vmatprep.subr.bf16.mxu0 %v5868_v46  ;;  %v6189_v39 = vsub.f32 %v215_v19, %v2027_v47  ;;  %v278_v46 = vsel %vm261_vm0, %v246_v16, 0  ;;  %v281_v35 = vsel %vm261_vm0, %v247_v25, 0  ;;  %v6224_v18 = vsub.f32 %v275_v37, %v6203_v61 }
  0xa4   : > { %5082 = vmatprep.subr.bf16.mxu1 %v5872_v48  ;;  %871 = vmatprep.mubr.f32.mxu0 %v7118_v0  ;;  %v6199_v48 = vsub.f32 %v6115_v2, %v7117_v22  ;;  %v6217_v38 = vand.u32 4294901760, %v278_v46  ;;  %v6226_v19 = vand.u32 4294901760, %v281_v35  ;;  %v7112_v6 = vand.u32 4294901760, %v6171_v23 }
  0xa5   : > { %1440 = vmatprep.mubr.f32.mxu1 %v7118_v0  ;;  %v1550_v47 = vand.u32 4294901760, %v1549_v57  ;;  %v7113_v37 = vand.u32 4294901760, %v6185_v52  ;;  %v2107_v25 = vand.u32 4294901760, %v2106_v26  ;;  %v7120_v57 = vand.u32 4294901760, %v6193_v60 }
  0xa6   : > { %5036 = vmatpush1.bf16.msra.mxu0 %v5891_v59  ;;  %v7106_v59 = vand.u32 4294901760, %v6150_v41  ;;  %v1538_v34 = vand.u32 4294901760, %v6199_v48  ;;  %v7115_v48 = vand.u32 4294901760, %v6189_v39  ;;  %v6267_v5 = vsub.f32 %v278_v46, %v6217_v38 }
  0xa7   : > { %5084 = vmatpush1.bf16.msra.mxu1 %v5900_v1  ;;  %814 = vmatprep.subr.mxu0 %v5898_v62  ;;  %v7105_v1 = vand.u32 4294901760, %v6159_v49  ;;  %v7104_v62 = vand.u32 4294901760, %v6161_v21  ;;  %v2142_v26 = vsub.f32 %v6171_v23, %v7112_v6  ;;  %v1544_v46 = vand.u32 4294901760, %v1543_v28 }
  0xa8   : > { %1383 = vmatprep.subr.mxu1 %v5905_v3  ;;  %v2118_v3 = vsub.f32 %v6133_v31, %v7109_v36  ;;  %v2112_v9 = vsub.f32 %v6150_v41, %v7106_v59  ;;  %v6278_v59 = vsub.f32 %v284_v12, %v6219_v17  ;;  %v2125_v36 = vand.u32 4294901760, %v2124_v58 }
  0xa9   : > { %v1573_v16 = vsub.f32 %v6161_v21, %v7104_v62  ;;  %v1579_v12 = vsub.f32 %v6185_v52, %v7113_v37  ;;  %v6291_v6 = vsub.f32 %v281_v35, %v6226_v19  ;;  %v2136_v28 = vsub.f32 %v6189_v39, %v7115_v48 }
  0xaa   : > { %816 = vmatpush1.msra.mxu0 %v5907_v4  ;;  %v1555_v4 = vsub.f32 %v6143_v51, %v7107_v53  ;;  %v2119_v62 = vand.u32 4294901760, %v2118_v3  ;;  %v2113_v32 = vand.u32 4294901760, %v2112_v9  ;;  %v5093_v58 = vpack.c.bf16 %v1550_v47, %v1538_v34 }
  0xab   : > { %1385 = vmatpush1.msra.mxu1 %v5919_v10  ;;  %873 = vmatmul.mubr.f32.vlgmr.msra.gmra.mrb[0].mxu0 %v5933_v20  ;;  %v1561_v10 = vsub.f32 %v6159_v49, %v7105_v1  ;;  %v2130_v1 = vsub.f32 %v6169_v8, %v7111_v40  ;;  %v1574_v13 = vand.u32 4294901760, %v1573_v16  ;;  %v1567_v40 = vsub.f32 %v6178_v29, %v7114_v11 }
  0xac   : > { %1442 = vmatmul.mubr.f32.vlgmr.msra.gmra.mrb[0].mxu1 %v5933_v20  ;;  %5086 = vmatprep.subr.bf16.mxu0 %v6121_v15  ;;  %v1556_v53 = vand.u32 4294901760, %v1555_v4  ;;  %v2148_v4 = vsub.f32 %v6193_v60, %v7120_v57  ;;  %v2143_v16 = vand.u32 4294901760, %v2142_v26  ;;  %v2153_v35 = vand.u32 4294901760, %v6278_v59 }
  0xad   : > { %5134 = vmatprep.subr.bf16.mxu1 %v6125_v63  ;;  %5088 = vmatpush1.bf16.msra.mxu0 %v6137_v54  ;;  %v1562_v3 = vand.u32 4294901760, %v1561_v10  ;;  %v2131_v10 = vand.u32 4294901760, %v2130_v1  ;;  %v5141_v37 = vpack.c.bf16 %v2119_v62, %v2107_v25  ;;  %v5143_v48 = vpack.c.bf16 %v2125_v36, %v2113_v32 }
  0xae   : > { %5136 = vmatpush1.bf16.msra.mxu1 %v6145_v55  ;;  %5090 = vmatprep.subr.bf16.mxu0 %v6157_v7  ;;  %v5095_v11 = vpack.c.bf16 %v1556_v53, %v1544_v46  ;;  %v1568_v22 = vand.u32 4294901760, %v1567_v40  ;;  %v1590_v57 = vand.u32 4294901760, %v6224_v18  ;;  %v2137_v9 = vand.u32 4294901760, %v2136_v28 }
  0xaf   : > { %5138 = vmatprep.subr.bf16.mxu1 %v6167_v50  ;;  %1522 = vmatprep.mubr.f32.mxu0 %v7118_v0  ;;  %v5097_v44 = vpack.c.bf16 %v1574_v13, %v1562_v3  ;;  %v2149_v43 = vand.u32 4294901760, %v2148_v4  ;;  %v7181_v34 = vand.u32 4294901760, %v6267_v5  ;;  %v2159_v47 = vand.u32 4294901760, %v6291_v6 }
  0xb0   : > { %2091 = vmatprep.mubr.f32.mxu1 %v7118_v0  ;;  %v1580_v0 = vand.u32 4294901760, %v1579_v12  ;;  %v5145_v53 = vpack.c.bf16 %v2143_v16, %v2131_v10  ;;  %v2154_v13 = vsub.f32 %v6278_v59, %v2153_v35  ;;  %v1591_v32 = vsub.f32 %v6224_v18, %v1590_v57 }
  0xb1   : > { %5092 = vmatpush1.bf16.msra.mxu0 %v6176_v27  ;;  %v1585_v1 = vsub.f32 %v6267_v5, %v7181_v34  ;;  %v5147_v62 = vpack.c.bf16 %v2149_v43, %v2137_v9  ;;  %v2160_v25 = vsub.f32 %v6291_v6, %v2159_v47  ;;  %v7182_v26 = vmov 0.0  }
  0xb2   : > { %5140 = vmatpush1.bf16.msra.mxu1 %v6187_v45  ;;  %1465 = vmatprep.subr.mxu0 %v6217_v38  ;;  %v5099_v36 = vpack.c.bf16 %v1580_v0, %v1568_v22  ;;  %v1592_v0 = vand.u32 4294901760, %v1591_v32  ;;  %v5149_v43 = vpack.c.bf16 %v6133_v31, %v6131_v14  ;;  %v5105_v46 = vpack.c.bf16 %v6161_v21, %v6159_v49 }
  0xb3   : > { %2034 = vmatprep.subr.mxu1 %v6219_v17  ;;  %v1586_v40 = vand.u32 4294901760, %v1585_v1  ;;  %v2161_v22 = vand.u32 4294901760, %v2160_v25  ;;  %v5153_v3 = vpack.c.bf16 %v6171_v23, %v6169_v8  ;;  %v5107_v12 = vpack.c.bf16 %v6185_v52, %v6178_v29 }
  0xb4   : > { %v5155_v28 = vpack.c.bf16 %v6193_v60, %v6189_v39  ;;  %v7183_v4 = vand.u32 4294901760, %v6115_v2  ;;  %v7184_v9 = vand.u32 4294901760, %v6123_v56  ;;  %v7185_v10 = vand.u32 4294901760, %v6131_v14 }
  0xb5   : > { %1467 = vmatpush1.msra.mxu0 %v6203_v61  ;;  %v7186_v16 = vand.u32 4294901760, %v6133_v31  ;;  %v7187_v1 = vand.u32 4294901760, %v6139_v24  ;;  %v7191_v32 = vand.u32 4294901760, %v6159_v49  ;;  %v186_v31 = vld [vmem:[%s5808_s7 + $0x48] sm:$0xff]  ;;  %v188_v49 = vld [vmem:[%s5808_s7 + $0x58] sm:$0xff]  ;;  %v7196_v25 = vand.u32 4294901760, %v6178_v29 }
  0xb6   : > { %2036 = vmatpush1.msra.mxu1 %v6226_v19  ;;  %5094 = vmatprep.subr.bf16.mxu0 %v5093_v58  ;;  %v5117_v58 = vpack.c.bf16 %v7184_v9, %v7183_v4  ;;  %v3155_v29 = vand.u32 4294901760, %v188_v49 }
  0xb7   : > { %5142 = vmatprep.subr.bf16.mxu1 %v5141_v37  ;;  %1528 = vmatmul.mubr.f32.vlgmr.msra.gmra.mrb[2].mxu0 %v5974_v30  ;;  %v2155_v37 = vand.u32 4294901760, %v2154_v13  ;;  %v5165_v34 = vpack.c.bf16 %v7186_v16, %v7185_v10 }
  0xb8   : > { %5096 = vmatpush1.bf16.msra.mxu0 %v5095_v11  ;;  %2097 = vmatmul.mubr.f32.vlgmr.msra.gmra.mrb[2].mxu1 %v5974_v30  ;;  %v5103_v11 = vpack.c.bf16 %v6143_v51, %v6139_v24  ;;  %v7193_v24 = vand.u32 4294901760, %v6169_v8 }
  0xb9   : > { %5144 = vmatpush1.bf16.msra.mxu1 %v5143_v48  ;;  %5098 = vmatprep.subr.bf16.mxu0 %v5097_v44  ;;  %v5101_v44 = vpack.c.bf16 %v6123_v56, %v6115_v2  ;;  %v5151_v48 = vpack.c.bf16 %v6152_v42, %v6150_v41  ;;  %v7189_v2 = vand.u32 4294901760, %v6150_v41  ;;  %v7190_v56 = vand.u32 4294901760, %v6152_v42  ;;  %v7195_v42 = vld [vmem:[#allocation11_spill] sm:$0xff] }
  0xba   : > { %5146 = vmatprep.subr.bf16.mxu1 %v5145_v53  ;;  %1648 = vmatprep.mubr.f32.mxu0 %v7182_v26  ;;  %v7188_v53 = vand.u32 4294901760, %v6143_v51  ;;  %v7194_v51 = vand.u32 4294901760, %v6171_v23 }
  0xbb   : > { %2217 = vmatprep.mubr.f32.mxu1 %v7182_v26 }
  0xbc   : > { %5100 = vmatpush1.bf16.msra.mxu0 %v5099_v36  ;;  %v5119_v13 = vpack.c.bf16 %v7188_v53, %v7187_v1  ;;  %v5167_v36 = vpack.c.bf16 %v7190_v56, %v7189_v2  ;;  %v5169_v41 = vpack.c.bf16 %v7194_v51, %v7193_v24  ;;  %v217_v1 = vld [vmem:[%s5808_s7 + $0x140] sm:$0xff]  ;;  %v6422_v56 = vsub.f32 %v188_v49, %v3155_v29  ;;  %v219_v51 = vld [vmem:[%s5808_s7 + $0x150] sm:$0xff] }
  0xbd   : > { %5148 = vmatpush1.bf16.msra.mxu1 %v5147_v62  ;;  %1587 = vmatprep.subr.mxu0 %v1586_v40  ;;  %v7192_v62 = vand.u32 4294901760, %v6161_v21  ;;  %v202_v40 = vld [vmem:[%s5808_s7 + $0xc8] sm:$0xff]  ;;  %v204_v21 = vld [vmem:[%s5808_s7 + $0xd8] sm:$0xff]  ;;  %v233_v53 = vld [vmem:[%s5808_s7 + $0x1c0] sm:$0xff]  ;;  %v2596_v49 = vand.u32 4294901760, %v217_v1 }
  0xbe   : > { %2156 = vmatprep.subr.mxu1 %v2155_v37  ;;  %v7197_v37 = vand.u32 4294901760, %v6185_v52  ;;  %v2590_v23 = vand.u32 4294901760, %v202_v40  ;;  %v3159_v52 = vand.u32 4294901760, %v204_v21 }
  0xbf   : > { %v5121_v14 = vpack.c.bf16 %v7192_v62, %v7191_v32 }
  0xc0   : > { %1593 = vmatpush1.msra.mxu0 %v1592_v0  ;;  %v5123_v8 = vpack.c.bf16 %v7197_v37, %v7196_v25  ;;  %v2586_v0 = vand.u32 4294901760, %v186_v31  ;;  %v6420_v2 = vsub.f32 %v202_v40, %v2590_v23  ;;  %v6426_v62 = vpack.c.bf16 %v3159_v52, %v3155_v29 }
  0xc1   : > { %2162 = vmatpush1.msra.mxu1 %v2161_v22  ;;  %5102 = vmatprep.subr.bf16.mxu0 %v5101_v44  ;;  %v185_v22 = vld [vmem:[%s5808_s7 + $0x40] sm:$0xff]  ;;  %v2600_v25 = vand.u32 4294901760, %v233_v53 }
  0xc2   : > { %5150 = vmatprep.subr.bf16.mxu1 %v5149_v43  ;;  %1650 = vmatmul.mubr.f32.vlgmr.msra.gmra.mrb[2].mxu0 %v5933_v20  ;;  %v201_v44 = vld [vmem:[%s5808_s7 + $0xc0] sm:$0xff]  ;;  %v7198_v43 = vand.u32 4294901760, %v6189_v39  ;;  %v2588_v4 = vand.u32 4294901760, %v185_v22  ;;  %v236_v39 = vld [vmem:[%s5808_s7 + $0x1d8] sm:$0xff]  ;;  %v6414_v10 = vsub.f32 %v186_v31, %v2586_v0  ;;  %v7136_v29 = vand.u32 4294901760, %v6420_v2 }
  0xc3   : > { %5104 = vmatpush1.bf16.msra.mxu0 %v5103_v11  ;;  %2219 = vmatmul.mubr.f32.vlgmr.msra.gmra.mrb[2].mxu1 %v5933_v20  ;;  %v7199_v11 = vand.u32 4294901760, %v6193_v60  ;;  %v2592_v9 = vand.u32 4294901760, %v201_v44  ;;  %v6412_v60 = vpack.c.bf16 %v2590_v23, %v2586_v0  ;;  %v3167_v24 = vand.u32 4294901760, %v236_v39  ;;  %v249_v23 = vld [vmem:[%s5808_s7 + $0x240] sm:$0xf] }
  0xc4   : > { %5152 = vmatpush1.bf16.msra.mxu1 %v5151_v48  ;;  %5106 = vmatprep.subr.bf16.mxu0 %v5105_v46  ;;  %v187_v46 = vld [vmem:[%s5808_s7 + $0x50] sm:$0xff]  ;;  %v6434_v40 = vsub.f32 %v185_v22, %v2588_v4 }
  0xc5   : > { %5154 = vmatprep.subr.bf16.mxu1 %v5153_v3  ;;  %1740 = vmatprep.mubr.f32.mxu0 %v7182_v26  ;;  %v5171_v48 = vpack.c.bf16 %v7199_v11, %v7198_v43  ;;  %v203_v3 = vld [vmem:[%s5808_s7 + $0xd0] sm:$0xff]  ;;  %v3157_v16 = vand.u32 4294901760, %v187_v46  ;;  %v6468_v43 = vsub.f32 %v217_v1, %v2596_v49  ;;  %v252_v11 = vld [vmem:[%s5808_s7 + $0x258] sm:$0xf] }
  0xc6   : > { %2309 = vmatprep.mubr.f32.mxu1 %v7182_v26 }
  0xc7   : > { %5108 = vmatpush1.bf16.msra.mxu0 %v5107_v12  ;;  %v218_v12 = vld [vmem:[%s5808_s7 + $0x148] sm:$0xff] }
  0xc8   : > { %5156 = vmatpush1.bf16.msra.mxu1 %v5155_v28  ;;  %1682 = vmatprep.subr.mxu0 %v6267_v5  ;;  %v234_v28 = vld [vmem:[%s5808_s7 + $0x1c8] sm:$0xff] }
  0xc9   : > { %2251 = vmatprep.subr.mxu1 %v6278_v59  ;;  %v2598_v32 = vand.u32 4294901760, %v234_v28  ;;  %v6438_v59 = vsub.f32 %v201_v44, %v2592_v9  ;;  %v6466_v44 = vpack.c.bf16 %v2600_v25, %v2596_v49 }
  0xcb   : > { %1685 = vmatpush1.msra.mxu0 %v6224_v18  ;;  %v3165_v18 = vand.u32 4294901760, %v219_v51  ;;  %v6456_v22 = vsub.f32 %v234_v28, %v2598_v32  ;;  %v296_v28 = vsel %vm261_vm0, %v252_v11, 0  ;;  %v7134_v11 = vand.u32 4294901760, %v6468_v43 }
  0xcc   : > { %2254 = vmatpush1.msra.mxu1 %v6291_v6  ;;  %5110 = vmatprep.subr.bf16.mxu0 %v6121_v15 }
  0xcd   : > { %5158 = vmatprep.subr.bf16.mxu1 %v6125_v63  ;;  %1743 = vmatmul.mubr.f32.vlgmr.msra.gmra.mrb[2].mxu0 %v5945_v33 }
  0xce   : > { %5112 = vmatpush1.bf16.msra.mxu0 %v6137_v54  ;;  %2312 = vmatmul.mubr.f32.vlgmr.msra.gmra.mrb[2].mxu1 %v5945_v33 }
  0xcf   : > { %5160 = vmatpush1.bf16.msra.mxu1 %v6145_v55  ;;  %5114 = vmatprep.subr.bf16.mxu0 %v6157_v7 }
  0xd0   : > { %5162 = vmatprep.subr.bf16.mxu1 %v6167_v50  ;;  %1823 = vmatprep.mubr.f32.mxu0 %v7182_v26 }
  0xd1   : > { %2392 = vmatprep.mubr.f32.mxu1 %v7182_v26 }
  0xd2   : > { %5116 = vmatpush1.bf16.msra.mxu0 %v6176_v27 }
  0xd3   : > { %5164 = vmatpush1.bf16.msra.mxu1 %v6187_v45  ;;  %1766 = vmatprep.subr.mxu0 %v6217_v38 }
  0xd4   : > { %2335 = vmatprep.subr.mxu1 %v6219_v17 }
  0xd6   : > { %1768 = vmatpush1.msra.mxu0 %v6203_v61 }
  0xd7   : > { %2337 = vmatpush1.msra.mxu1 %v6226_v19  ;;  %5118 = vmatprep.subr.bf16.mxu0 %v5117_v58  ;;  %v220_v58 = vld [vmem:[%s5808_s7 + $0x158] sm:$0xff] }
  0xd8   : > { %5166 = vmatprep.subr.bf16.mxu1 %v5165_v34  ;;  %1827 = vmatmul.mubr.f32.vlgmr.msra.gmra.mrb[2].mxu0 %v7195_v42  ;;  %v3161_v34 = vand.u32 4294901760, %v203_v3  ;;  %v3163_v31 = vand.u32 4294901760, %v220_v58 }
  0xd9   : > { %5120 = vmatpush1.bf16.msra.mxu0 %v5119_v13  ;;  %2396 = vmatmul.mubr.f32.vlgmr.msra.gmra.mrb[2].mxu1 %v7195_v42  ;;  %v7200_v13 = vand.u32 4294901760, %v6267_v5  ;;  %v6432_v5 = vpack.c.bf16 %v2592_v9, %v2588_v4  ;;  %v7130_v4 = vand.u32 4294901760, %v6422_v56 }
  0xda   : > { %5168 = vmatpush1.bf16.msra.mxu1 %v5167_v36  ;;  %5122 = vmatprep.subr.bf16.mxu0 %v5121_v14  ;;  %v2594_v36 = vand.u32 4294901760, %v218_v12  ;;  %v6428_v14 = vsub.f32 %v204_v21, %v3159_v52  ;;  %v6442_v21 = vsub.f32 %v187_v46, %v3157_v16  ;;  %v6444_v37 = vsub.f32 %v203_v3, %v3161_v34  ;;  %v251_v3 = vld [vmem:[%s5808_s7 + $0x250] sm:$0xf] }
  0xdb   : > { %5170 = vmatprep.subr.bf16.mxu1 %v5169_v41  ;;  %1927 = vmatprep.mubr.f32.mxu0 %v7182_v26  ;;  %v235_v41 = vld [vmem:[%s5808_s7 + $0x1d0] sm:$0xff]  ;;  %v6458_v6 = vpack.c.bf16 %v3167_v24, %v3163_v31  ;;  %v287_v46 = vsel %vm261_vm0, %v249_v23, 0 }
  0xdc   : > { %2496 = vmatprep.mubr.f32.mxu1 %v7182_v26  ;;  %v6451_v0 = vsub.f32 %v218_v12, %v2594_v36  ;;  %v6484_v12 = vsub.f32 %v219_v51, %v3165_v18  ;;  %v7129_v9 = vand.u32 4294901760, %v6428_v14  ;;  %v7126_v1 = vand.u32 4294901760, %v6442_v21 }
  0xdd   : > { %5124 = vmatpush1.bf16.msra.mxu0 %v5123_v8  ;;  %v6449_v8 = vpack.c.bf16 %v2598_v32, %v2594_v36  ;;  %v6512_v36 = vand.u32 4294901760, %v296_v28 }
  0xde   : > { %5172 = vmatpush1.bf16.msra.mxu1 %v5171_v48  ;;  %1868 = vmatprep.subr.mxu0 %v7200_v13  ;;  %v6474_v48 = vsub.f32 %v233_v53, %v2600_v25  ;;  %v7123_v53 = vand.u32 4294901760, %v6444_v37 }
  0xdf   : > { %2437 = vmatprep.subr.mxu1 %v2153_v35  ;;  %v6440_v35 = vpack.c.bf16 %v3161_v34, %v3157_v16  ;;  %v7127_v16 = vand.u32 4294901760, %v6438_v59 }
  0xe0   : > { %v3262_v23 = vsub.f32 %v6444_v37, %v7123_v53 }
  0xe1   : > { %1872 = vmatpush1.msra.mxu0 %v1590_v57  ;;  %v3169_v57 = vand.u32 4294901760, %v235_v41 }
  0xe2   : > { %2441 = vmatpush1.msra.mxu1 %v2159_v47  ;;  %5126 = vmatprep.subr.bf16.mxu0 %v6121_v15  ;;  %v6460_v47 = vsub.f32 %v220_v58, %v3163_v31  ;;  %v6464_v15 = vsub.f32 %v236_v39, %v3167_v24  ;;  %v293_v58 = vsel %vm261_vm0, %v251_v3, 0  ;;  %v7128_v39 = vand.u32 4294901760, %v6434_v40 }
  0xe3   : > { %5174 = vmatprep.subr.bf16.mxu1 %v6125_v63  ;;  %1929 = vmatmul.mubr.f32.vlgmr.msra.gmra.mrb[2].mxu0 %v5933_v20  ;;  %v250_v63 = vld [vmem:[%s5808_s7 + $0x248] sm:$0xf]  ;;  %v6482_v52 = vpack.c.bf16 %v3169_v57, %v3165_v18  ;;  %v6519_v31 = vand.u32 4294901760, %v293_v58  ;;  %v3244_v24 = vsub.f32 %v6422_v56, %v7130_v4 }
  0xe4   : > { %5128 = vmatpush1.bf16.msra.mxu0 %v6137_v54  ;;  %2498 = vmatmul.mubr.f32.vlgmr.msra.gmra.mrb[2].mxu1 %v5933_v20  ;;  %v7137_v54 = vand.u32 4294901760, %v6414_v10  ;;  %v2681_v51 = vsub.f32 %v6434_v40, %v7128_v39  ;;  %v7131_v49 = vand.u32 4294901760, %v6460_v47  ;;  %v7132_v25 = vand.u32 4294901760, %v6464_v15 }
  0xe5   : > { %5176 = vmatpush1.bf16.msra.mxu1 %v6145_v55  ;;  %5130 = vmatprep.subr.bf16.mxu0 %v6157_v7  ;;  %7201 = vst [vmem:[#allocation12_spill] sm:$0xff] %v6482_v52  ;;  %v6486_v55 = vsub.f32 %v235_v41, %v3169_v57  ;;  %v290_v7 = vsel %vm261_vm0, %v250_v63, 0  ;;  %v2693_v41 = vsub.f32 %v6438_v59, %v7127_v16  ;;  %v3245_v3 = vand.u32 4294901760, %v3244_v24 }
  0xe6   : > { %5178 = vmatprep.subr.bf16.mxu1 %v6167_v50  ;;  %2009 = vmatprep.mubr.f32.mxu0 %v7182_v26  ;;  %v6494_v50 = vand.u32 4294901760, %v287_v46  ;;  %v2675_v34 = vsub.f32 %v6414_v10, %v7137_v54  ;;  %v6510_v13 = vand.u32 4294901760, %v290_v7  ;;  %v3280_v24 = vsub.f32 %v6464_v15, %v7132_v25 }
  0xe7   : > { %2578 = vmatprep.mubr.f32.mxu1 %v7182_v26  ;;  %v2694_v16 = vand.u32 4294901760, %v2693_v41  ;;  %v6583_v25 = vsub.f32 %v293_v58, %v6519_v31 }
  0xe8   : > { %5132 = vmatpush1.bf16.msra.mxu0 %v6176_v27  ;;  %v2687_v27 = vsub.f32 %v6420_v2, %v7136_v29  ;;  %v6517_v32 = vsub.f32 %v287_v46, %v6494_v50  ;;  %v2676_v18 = vand.u32 4294901760, %v2675_v34  ;;  %v7133_v46 = vand.u32 4294901760, %v6474_v48 }
  0xe9   : > { %5180 = vmatpush1.bf16.msra.mxu1 %v6187_v45  ;;  %1952 = vmatprep.subr.mxu0 %v6217_v38  ;;  %v7125_v45 = vand.u32 4294901760, %v6451_v0  ;;  %v7124_v38 = vand.u32 4294901760, %v6456_v22  ;;  %v7135_v34 = vand.u32 4294901760, %v6484_v12  ;;  %v6559_v53 = vsub.f32 %v290_v7, %v6510_v13 }
  0xea   : > { %2521 = vmatprep.subr.mxu1 %v6219_v17  ;;  %v3256_v17 = vsub.f32 %v6428_v14, %v7129_v9  ;;  %v2688_v57 = vand.u32 4294901760, %v2687_v27  ;;  %v7139_v27 = vand.u32 4294901760, %v6486_v55  ;;  %v2682_v7 = vand.u32 4294901760, %v2681_v51 }
  0xeb   : > { %v2711_v63 = vsub.f32 %v6456_v22, %v7124_v38  ;;  %v3263_v9 = vand.u32 4294901760, %v3262_v23  ;;  %v3274_v51 = vsub.f32 %v6484_v12, %v7135_v34 }
  0xec   : > { %1954 = vmatpush1.msra.mxu0 %v6203_v61  ;;  %v3250_v61 = vsub.f32 %v6442_v21, %v7126_v1  ;;  %v3257_v38 = vand.u32 4294901760, %v3256_v17  ;;  %v6570_v1 = vsub.f32 %v296_v28, %v6512_v36  ;;  %v2717_v28 = vsub.f32 %v6474_v48, %v7133_v46 }
  0xed   : > { %2523 = vmatpush1.msra.mxu1 %v6226_v19  ;;  %2011 = vmatmul.mubr.f32.vlgmr.msra.gmra.mrb[2].mxu0 %v5933_v20  ;;  %v2699_v19 = vsub.f32 %v6451_v0, %v7125_v45  ;;  %v3268_v45 = vsub.f32 %v6460_v47, %v7131_v49  ;;  %v2712_v4 = vand.u32 4294901760, %v2711_v63  ;;  %v2705_v49 = vsub.f32 %v6468_v43, %v7134_v11 }
  0xee   : > { %2580 = vmatmul.mubr.f32.vlgmr.msra.gmra.mrb[2].mxu1 %v5933_v20  ;;  %5182 = vmatprep.subr.bf16.mxu0 %v6412_v60  ;;  %v3251_v39 = vand.u32 4294901760, %v3250_v61  ;;  %v3286_v41 = vsub.f32 %v6486_v55, %v7139_v27  ;;  %v5189_v23 = vpack.c.bf16 %v2688_v57, %v2676_v18  ;;  %v3281_v63 = vand.u32 4294901760, %v3280_v24 }
  0xef   : > { %5230 = vmatprep.subr.bf16.mxu1 %v6426_v62  ;;  %5184 = vmatpush1.bf16.msra.mxu0 %v6432_v5  ;;  %v2700_v17 = vand.u32 4294901760, %v2699_v19  ;;  %v3269_v19 = vand.u32 4294901760, %v3268_v45  ;;  %v3291_v58 = vand.u32 4294901760, %v6570_v1  ;;  %v5237_v46 = vpack.c.bf16 %v3257_v38, %v3245_v3 }
  0xf0   : > { %5232 = vmatpush1.bf16.msra.mxu1 %v6440_v35  ;;  %5186 = vmatprep.subr.bf16.mxu0 %v6449_v8  ;;  %v5191_v11 = vpack.c.bf16 %v2694_v16, %v2682_v7  ;;  %v5239_v34 = vpack.c.bf16 %v3263_v9, %v3251_v39  ;;  %v2706_v54 = vand.u32 4294901760, %v2705_v49  ;;  %v2718_v42 = vand.u32 4294901760, %v2717_v28 }
  0xf1   : > { %5234 = vmatprep.subr.bf16.mxu1 %v6458_v6  ;;  %2660 = vmatprep.mubr.f32.mxu0 %v7182_v26  ;;  %v5193_v29 = vpack.c.bf16 %v2712_v4, %v2700_v17  ;;  %v2728_v27 = vand.u32 4294901760, %v6517_v32  ;;  %v3275_v61 = vand.u32 4294901760, %v3274_v51  ;;  %v7202_v18 = vand.u32 4294901760, %v6559_v53  ;;  %v7203_v51 = vld [vmem:[#allocation12_spill] sm:$0xff] }
  0xf2   : > { %3229 = vmatprep.mubr.f32.mxu1 %v7182_v26  ;;  %v3297_v57 = vand.u32 4294901760, %v6583_v25  ;;  %v5241_v16 = vpack.c.bf16 %v3281_v63, %v3269_v19  ;;  %v3292_v4 = vsub.f32 %v6570_v1, %v3291_v58  ;;  %v5195_v9 = vpack.c.bf16 %v2718_v42, %v2706_v54 }
  0xf3   : > { %5188 = vmatpush1.bf16.msra.mxu0 %v6466_v44  ;;  %v2723_v45 = vsub.f32 %v6559_v53, %v7202_v18  ;;  %v2729_v39 = vsub.f32 %v6517_v32, %v2728_v27  ;;  %v5201_v24 = vpack.c.bf16 %v6456_v22, %v6451_v0  ;;  %v5249_v7 = vpack.c.bf16 %v6464_v15, %v6460_v47 }
  0xf4   : > { %5236 = vmatpush1.bf16.msra.mxu1 %v6482_v52  ;;  %2603 = vmatprep.subr.mxu0 %v6510_v13  ;;  %v3287_v52 = vand.u32 4294901760, %v3286_v41  ;;  %v3298_v3 = vsub.f32 %v6583_v25, %v3297_v57  ;;  %v5203_v17 = vpack.c.bf16 %v6474_v48, %v6468_v43  ;;  %v5251_v28 = vpack.c.bf16 %v6486_v55, %v6484_v12 }
  0xf5   : > { %3172 = vmatprep.subr.mxu1 %v6512_v36  ;;  %v2724_v49 = vand.u32 4294901760, %v2723_v45  ;;  %v2730_v42 = vand.u32 4294901760, %v2729_v39  ;;  %v7204_v41 = vand.u32 4294901760, %v6414_v10  ;;  %v7206_v19 = vand.u32 4294901760, %v6422_v56 }
  0xf6   : > { %v5243_v38 = vpack.c.bf16 %v3287_v52, %v3275_v61  ;;  %v3299_v54 = vand.u32 4294901760, %v3298_v3  ;;  %v5245_v52 = vpack.c.bf16 %v6428_v14, %v6422_v56  ;;  %v7205_v61 = vand.u32 4294901760, %v6420_v2  ;;  %v208_v3 = vld [vmem:[%s5808_s7 + $0xf8] sm:$0xff] }
  0xf7   : > { %2605 = vmatpush1.msra.mxu0 %v6494_v50  ;;  %v7207_v63 = vand.u32 4294901760, %v6428_v14  ;;  %v7208_v45 = vand.u32 4294901760, %v6434_v40  ;;  %v7212_v39 = vand.u32 4294901760, %v6451_v0  ;;  %v7213_v56 = vand.u32 4294901760, %v6456_v22  ;;  %v192_v0 = vld [vmem:[%s5808_s7 + $0x78] sm:$0xff] }
  0xf8   : > { %3174 = vmatpush1.msra.mxu1 %v6519_v31  ;;  %5190 = vmatprep.subr.bf16.mxu0 %v5189_v23  ;;  %v5213_v23 = vpack.c.bf16 %v7205_v61, %v7204_v41  ;;  %v7214_v14 = vand.u32 4294901760, %v6460_v47  ;;  %v7217_v22 = vand.u32 4294901760, %v6468_v43  ;;  %v7218_v47 = vand.u32 4294901760, %v6474_v48 }
  0xf9   : > { %5238 = vmatprep.subr.bf16.mxu1 %v5237_v46  ;;  %2666 = vmatmul.mubr.f32.vlgmr.msra.gmra.mrb[4].mxu0 %v5974_v30  ;;  %v3293_v46 = vand.u32 4294901760, %v3292_v4  ;;  %v5261_v18 = vpack.c.bf16 %v7207_v63, %v7206_v19  ;;  %v4293_v43 = vand.u32 4294901760, %v192_v0  ;;  %v4297_v48 = vand.u32 4294901760, %v208_v3  ;;  %v240_v19 = vld [vmem:[%s5808_s7 + $0x1f8] sm:$0xff] }
  0xfa   : > { %5192 = vmatpush1.bf16.msra.mxu0 %v5191_v11  ;;  %3235 = vmatmul.mubr.f32.vlgmr.msra.gmra.mrb[4].mxu1 %v5974_v30  ;;  %v5199_v11 = vpack.c.bf16 %v6438_v59, %v6434_v40  ;;  %v7215_v40 = vand.u32 4294901760, %v6464_v15  ;;  %v5219_v15 = vpack.c.bf16 %v7218_v47, %v7217_v22  ;;  %v7221_v63 = vand.u32 4294901760, %v6559_v53 }
  0xfb   : > { %5240 = vmatpush1.bf16.msra.mxu1 %v5239_v34  ;;  %5194 = vmatprep.subr.bf16.mxu0 %v5193_v29  ;;  %v5197_v29 = vpack.c.bf16 %v6420_v2, %v6414_v10  ;;  %v5247_v34 = vpack.c.bf16 %v6444_v37, %v6442_v21  ;;  %v7210_v10 = vand.u32 4294901760, %v6442_v21  ;;  %v7211_v2 = vand.u32 4294901760, %v6444_v37  ;;  %v206_v21 = vld [vmem:[%s5808_s7 + $0xe8] sm:$0xff] }
  0xfc   : > { %5242 = vmatprep.subr.bf16.mxu1 %v5241_v16  ;;  %2786 = vmatprep.mubr.f32.mxu0 %v7182_v26  ;;  %v7209_v16 = vand.u32 4294901760, %v6438_v59  ;;  %v5265_v59 = vpack.c.bf16 %v7215_v40, %v7214_v14  ;;  %v7216_v37 = vld [vmem:[#allocation11_spill] sm:$0xff]  ;;  %v4305_v40 = vand.u32 4294901760, %v240_v19 }
  0xfd   : > { %3355 = vmatprep.mubr.f32.mxu1 %v7182_v26 }
  0xfe   : > { %5196 = vmatpush1.bf16.msra.mxu0 %v5195_v9  ;;  %v5215_v4 = vpack.c.bf16 %v7209_v16, %v7208_v45  ;;  %v5263_v9 = vpack.c.bf16 %v7211_v2, %v7210_v10  ;;  %v6714_v2 = vpack.c.bf16 %v4297_v48, %v4293_v43 }
  0xff   : > { %5244 = vmatpush1.bf16.msra.mxu1 %v5243_v38  ;;  %2725 = vmatprep.subr.mxu0 %v2724_v49  ;;  %v5217_v38 = vpack.c.bf16 %v7213_v56, %v7212_v39  ;;  %v190_v49 = vld [vmem:[%s5808_s7 + $0x68] sm:$0xff]  ;;  %v237_v39 = vld [vmem:[%s5808_s7 + $0x1e0] sm:$0xff]  ;;  %v6720_v56 = vsub.f32 %v208_v3, %v4297_v48 }
 0x100   : > { %3294 = vmatprep.subr.mxu1 %v3293_v46  ;;  %v189_v46 = vld [vmem:[%s5808_s7 + $0x60] sm:$0xff] }
 0x102   : > { %2731 = vmatpush1.msra.mxu0 %v2730_v42  ;;  %v7219_v42 = vand.u32 4294901760, %v6484_v12  ;;  %v3726_v12 = vand.u32 4294901760, %v189_v46 }
 0x103   : > { %3300 = vmatpush1.msra.mxu1 %v3299_v54  ;;  %5198 = vmatprep.subr.bf16.mxu0 %v5197_v29  ;;  %v7220_v54 = vand.u32 4294901760, %v6486_v55 }
 0x104   : > { %5246 = vmatprep.subr.bf16.mxu1 %v5245_v52  ;;  %2788 = vmatmul.mubr.f32.vlgmr.msra.gmra.mrb[4].mxu0 %v5933_v20  ;;  %v3724_v52 = vand.u32 4294901760, %v190_v49 }
 0x105   : > { %5200 = vmatpush1.bf16.msra.mxu0 %v5199_v11  ;;  %3357 = vmatmul.mubr.f32.vlgmr.msra.gmra.mrb[4].mxu1 %v5933_v20  ;;  %v5267_v29 = vpack.c.bf16 %v7220_v54, %v7219_v42  ;;  %v3728_v11 = vand.u32 4294901760, %v206_v21 }
 0x106   : > { %5248 = vmatpush1.bf16.msra.mxu1 %v5247_v34  ;;  %5202 = vmatprep.subr.bf16.mxu0 %v5201_v24  ;;  %v205_v34 = vld [vmem:[%s5808_s7 + $0xe0] sm:$0xff]  ;;  %v191_v24 = vld [vmem:[%s5808_s7 + $0x70] sm:$0xff] }
 0x107   : > { %5250 = vmatprep.subr.bf16.mxu1 %v5249_v7  ;;  %2878 = vmatprep.mubr.f32.mxu0 %v7182_v26  ;;  %v207_v7 = vld [vmem:[%s5808_s7 + $0xf0] sm:$0xff]  ;;  %v3730_v55 = vand.u32 4294901760, %v205_v34  ;;  %v4295_v41 = vand.u32 4294901760, %v191_v24  ;;  %v6712_v10 = vsub.f32 %v206_v21, %v3728_v11 }
 0x108   : > { %3447 = vmatprep.mubr.f32.mxu1 %v7182_v26  ;;  %v4299_v61 = vand.u32 4294901760, %v207_v7 }
 0x109   : > { %5204 = vmatpush1.bf16.msra.mxu0 %v5203_v17  ;;  %v222_v17 = vld [vmem:[%s5808_s7 + $0x168] sm:$0xff]  ;;  %v6731_v21 = vsub.f32 %v205_v34, %v3730_v55  ;;  %v6735_v3 = vsub.f32 %v191_v24, %v4295_v41  ;;  %v255_v24 = vld [vmem:[%s5808_s7 + $0x270] sm:$0xf] }
 0x10a   : > { %5252 = vmatpush1.bf16.msra.mxu1 %v5251_v28  ;;  %2820 = vmatprep.subr.mxu0 %v6559_v53  ;;  %v238_v28 = vld [vmem:[%s5808_s7 + $0x1e8] sm:$0xff]  ;;  %v3732_v45 = vand.u32 4294901760, %v222_v17  ;;  %v221_v53 = vld [vmem:[%s5808_s7 + $0x160] sm:$0xff]  ;;  %v6740_v22 = vsub.f32 %v207_v7, %v4299_v61  ;;  %v7155_v7 = vand.u32 4294901760, %v6712_v10 }
 0x10b   : > { %3389 = vmatprep.subr.mxu1 %v6570_v1  ;;  %v3736_v16 = vand.u32 4294901760, %v238_v28  ;;  %v223_v1 = vld [vmem:[%s5808_s7 + $0x170] sm:$0xff] }
 0x10c   : > { %v6748_v42 = vsub.f32 %v222_v17, %v3732_v45  ;;  %v4303_v54 = vand.u32 4294901760, %v223_v1 }
 0x10d   : > { %2823 = vmatpush1.msra.mxu0 %v6517_v32  ;;  %v6742_v47 = vpack.c.bf16 %v3736_v16, %v3732_v45  ;;  %v3738_v32 = vand.u32 4294901760, %v237_v39  ;;  %v7144_v45 = vand.u32 4294901760, %v6740_v22 }
 0x10e   : > { %3392 = vmatpush1.msra.mxu1 %v6583_v25  ;;  %5206 = vmatprep.subr.bf16.mxu0 %v6412_v60 }
 0x10f   : > { %5254 = vmatprep.subr.bf16.mxu1 %v6426_v62  ;;  %2881 = vmatmul.mubr.f32.vlgmr.msra.gmra.mrb[4].mxu0 %v5945_v33 }
 0x110   : > { %5208 = vmatpush1.bf16.msra.mxu0 %v6432_v5  ;;  %3450 = vmatmul.mubr.f32.vlgmr.msra.gmra.mrb[4].mxu1 %v5945_v33 }
 0x111   : > { %5256 = vmatpush1.bf16.msra.mxu1 %v6440_v35  ;;  %5210 = vmatprep.subr.bf16.mxu0 %v6449_v8 }
 0x112   : > { %5258 = vmatprep.subr.bf16.mxu1 %v6458_v6  ;;  %2961 = vmatprep.mubr.f32.mxu0 %v7182_v26 }
 0x113   : > { %3530 = vmatprep.mubr.f32.mxu1 %v7182_v26 }
 0x114   : > { %5212 = vmatpush1.bf16.msra.mxu0 %v6466_v44 }
 0x115   : > { %5260 = vmatpush1.bf16.msra.mxu1 %v7203_v51  ;;  %2904 = vmatprep.subr.mxu0 %v6510_v13 }
 0x116   : > { %3473 = vmatprep.subr.mxu1 %v6512_v36 }
 0x118   : > { %2906 = vmatpush1.msra.mxu0 %v6494_v50 }
 0x119   : > { %3475 = vmatpush1.msra.mxu1 %v6519_v31  ;;  %5214 = vmatprep.subr.bf16.mxu0 %v5213_v23  ;;  %v224_v23 = vld [vmem:[%s5808_s7 + $0x178] sm:$0xff] }
 0x11a   : > { %5262 = vmatprep.subr.bf16.mxu1 %v5261_v18  ;;  %2965 = vmatmul.mubr.f32.vlgmr.msra.gmra.mrb[4].mxu0 %v7216_v37  ;;  %v6706_v18 = vpack.c.bf16 %v3728_v11, %v3724_v52  ;;  %v4301_v14 = vand.u32 4294901760, %v224_v23  ;;  %v6764_v11 = vsub.f32 %v240_v19, %v4305_v40  ;;  %v3825_v19 = vsub.f32 %v6712_v10, %v7155_v7 }
 0x11b   : > { %5216 = vmatpush1.bf16.msra.mxu0 %v5215_v4  ;;  %3534 = vmatmul.mubr.f32.vlgmr.msra.gmra.mrb[4].mxu1 %v7216_v37  ;;  %v6710_v4 = vsub.f32 %v190_v49, %v3724_v52  ;;  %v6729_v49 = vpack.c.bf16 %v3730_v55, %v3726_v12 }
 0x11c   : > { %5264 = vmatpush1.bf16.msra.mxu1 %v5263_v9  ;;  %5218 = vmatprep.subr.bf16.mxu0 %v5217_v38  ;;  %v6716_v9 = vsub.f32 %v192_v0, %v4293_v43  ;;  %v6722_v38 = vsub.f32 %v189_v46, %v3726_v12  ;;  %v6733_v0 = vpack.c.bf16 %v4299_v61, %v4295_v41  ;;  %v253_v46 = vld [vmem:[%s5808_s7 + $0x260] sm:$0xf]  ;;  %v305_v41 = vsel %vm261_vm0, %v255_v24, 0 }
 0x11d   : > { %5266 = vmatprep.subr.bf16.mxu1 %v5265_v59  ;;  %3065 = vmatprep.mubr.f32.mxu0 %v7182_v26  ;;  %v254_v59 = vld [vmem:[%s5808_s7 + $0x268] sm:$0xf]  ;;  %v6759_v52 = vsub.f32 %v224_v23, %v4301_v14 }
 0x11e   : > { %3634 = vmatprep.mubr.f32.mxu1 %v7182_v26  ;;  %v7151_v12 = vand.u32 4294901760, %v6716_v9  ;;  %v7147_v23 = vand.u32 4294901760, %v6722_v38 }
 0x11f   : > { %5220 = vmatpush1.bf16.msra.mxu0 %v5219_v15  ;;  %v3734_v15 = vand.u32 4294901760, %v221_v53 }
 0x120   : > { %5268 = vmatpush1.bf16.msra.mxu1 %v5267_v29  ;;  %3006 = vmatprep.subr.mxu0 %v7221_v63  ;;  %v6757_v29 = vpack.c.bf16 %v4305_v40, %v4301_v14  ;;  %v7145_v63 = vand.u32 4294901760, %v6735_v3  ;;  %v6819_v14 = vand.u32 4294901760, %v305_v41  ;;  %v4382_v40 = vsub.f32 %v6716_v9, %v7151_v12 }
 0x121   : > { %3575 = vmatprep.subr.mxu1 %v3291_v58  ;;  %v239_v58 = vld [vmem:[%s5808_s7 + $0x1f0] sm:$0xff]  ;;  %v6774_v43 = vpack.c.bf16 %v3738_v32, %v3734_v15  ;;  %v6776_v48 = vsub.f32 %v221_v53, %v3734_v15  ;;  %v7150_v15 = vand.u32 4294901760, %v6764_v11 }
 0x122   : > { %v4307_v25 = vand.u32 4294901760, %v239_v58  ;;  %v4383_v24 = vand.u32 4294901760, %v4382_v40  ;;  %v6886_v12 = vsub.f32 %v305_v41, %v6819_v14 }
 0x123   : > { %3010 = vmatpush1.msra.mxu0 %v2728_v27  ;;  %v256_v27 = vld [vmem:[%s5808_s7 + $0x278] sm:$0xf]  ;;  %v4418_v40 = vsub.f32 %v6764_v11, %v7150_v15 }
 0x124   : > { %3579 = vmatpush1.msra.mxu1 %v3297_v57  ;;  %5222 = vmatprep.subr.bf16.mxu0 %v6412_v60  ;;  %v6751_v57 = vsel %vm261_vm0, %v254_v59, 0  ;;  %v6755_v60 = vsub.f32 %v238_v28, %v3736_v16  ;;  %v6767_v34 = vsel %vm261_vm0, %v256_v27, 0  ;;  %v6784_v17 = vpack.c.bf16 %v4307_v25, %v4303_v54 }
 0x125   : > { %5270 = vmatprep.subr.bf16.mxu1 %v6426_v62  ;;  %3067 = vmatmul.mubr.f32.vlgmr.msra.gmra.mrb[4].mxu0 %v5933_v20  ;;  %v7156_v62 = vand.u32 4294901760, %v6710_v4  ;;  %v6786_v28 = vsub.f32 %v223_v1, %v4303_v54  ;;  %v6809_v16 = vsub.f32 %v239_v58, %v4307_v25  ;;  %v6812_v53 = vand.u32 4294901760, %v6767_v34 }
 0x126   : > { %5224 = vmatpush1.bf16.msra.mxu0 %v6432_v5  ;;  %3636 = vmatmul.mubr.f32.vlgmr.msra.gmra.mrb[4].mxu1 %v5933_v20  ;;  %v299_v5 = vsel %vm261_vm0, %v253_v46, 0  ;;  %7222 = vst [vmem:[#allocation12_spill] sm:$0xff] %v6784_v17  ;;  %v3819_v58 = vsub.f32 %v6722_v38, %v7147_v23  ;;  %v7149_v59 = vand.u32 4294901760, %v6759_v52  ;;  %v4400_v46 = vsub.f32 %v6740_v22, %v7144_v45 }
 0x127   : > { %5272 = vmatpush1.bf16.msra.mxu1 %v6440_v35  ;;  %5226 = vmatprep.subr.bf16.mxu0 %v6449_v8  ;;  %v6778_v35 = vsub.f32 %v237_v39, %v3738_v32  ;;  %v6781_v8 = vand.u32 4294901760, %v6751_v57  ;;  %v6791_v55 = vand.u32 4294901760, %v299_v5  ;;  %v6797_v61 = vsub.f32 %v6710_v4, %v7156_v62 }
 0x128   : > { %5274 = vmatprep.subr.bf16.mxu1 %v6458_v6  ;;  %3147 = vmatprep.mubr.f32.mxu0 %v7182_v26  ;;  %v7148_v6 = vand.u32 4294901760, %v6720_v56  ;;  %v3826_v32 = vand.u32 4294901760, %v3825_v19  ;;  %v7153_v25 = vand.u32 4294901760, %v6776_v48  ;;  %v7158_v19 = vand.u32 4294901760, %v6809_v16 }
 0x129   : > { %3716 = vmatprep.mubr.f32.mxu1 %v7182_v26  ;;  %v6817_v39 = vsub.f32 %v299_v5, %v6791_v55  ;;  %v3814_v1 = vand.u32 4294901760, %v6797_v61  ;;  %v7152_v5 = vand.u32 4294901760, %v6778_v35  ;;  %v7154_v61 = vand.u32 4294901760, %v6786_v28 }
 0x12a   : > { %5228 = vmatpush1.bf16.msra.mxu0 %v6466_v44  ;;  %v7146_v44 = vand.u32 4294901760, %v6731_v21  ;;  %v4406_v45 = vsub.f32 %v6759_v52, %v7149_v59  ;;  %v3843_v15 = vsub.f32 %v6776_v48, %v7153_v25 }
 0x12b   : > { %5276 = vmatpush1.bf16.msra.mxu1 %v7203_v51  ;;  %3090 = vmatprep.subr.mxu0 %v6510_v13  ;;  %v7142_v51 = vand.u32 4294901760, %v6748_v42  ;;  %v7143_v13 = vand.u32 4294901760, %v6755_v60 }
 0x12c   : > { %3659 = vmatprep.subr.mxu1 %v6512_v36  ;;  %v4394_v36 = vsub.f32 %v6720_v56, %v7148_v6  ;;  %v3831_v27 = vsub.f32 %v6731_v21, %v7146_v44  ;;  %v3844_v62 = vand.u32 4294901760, %v3843_v15 }
 0x12d   : > { %v3849_v54 = vsub.f32 %v6755_v60, %v7143_v13 }
 0x12e   : > { %3092 = vmatpush1.msra.mxu0 %v6494_v50  ;;  %v4388_v50 = vsub.f32 %v6735_v3, %v7145_v63  ;;  %v4395_v13 = vand.u32 4294901760, %v4394_v36  ;;  %v6873_v63 = vsub.f32 %v6767_v34, %v6812_v53  ;;  %v3832_v44 = vand.u32 4294901760, %v3831_v27 }
 0x12f   : > { %3661 = vmatpush1.msra.mxu1 %v6519_v31  ;;  %3149 = vmatmul.mubr.f32.vlgmr.msra.gmra.mrb[4].mxu0 %v5933_v20  ;;  %v3837_v31 = vsub.f32 %v6748_v42, %v7142_v51  ;;  %v6861_v51 = vsub.f32 %v6751_v57, %v6781_v8  ;;  %v3820_v57 = vand.u32 4294901760, %v3819_v58  ;;  %v4401_v36 = vand.u32 4294901760, %v4400_v46 }
 0x130   : > { %3718 = vmatmul.mubr.f32.vlgmr.msra.gmra.mrb[4].mxu1 %v5933_v20  ;;  %5278 = vmatprep.subr.bf16.mxu0 %v6706_v18  ;;  %v4389_v23 = vand.u32 4294901760, %v4388_v50  ;;  %v3850_v59 = vand.u32 4294901760, %v3849_v54  ;;  %v3855_v34 = vsub.f32 %v6778_v35, %v7152_v5  ;;  %v4412_v58 = vsub.f32 %v6786_v28, %v7154_v61 }
 0x131   : > { %5326 = vmatprep.subr.bf16.mxu1 %v6714_v2  ;;  %5280 = vmatpush1.bf16.msra.mxu0 %v6729_v49  ;;  %v3838_v6 = vand.u32 4294901760, %v3837_v31  ;;  %v4424_v27 = vsub.f32 %v6809_v16, %v7158_v19  ;;  %v5285_v46 = vpack.c.bf16 %v3826_v32, %v3814_v1  ;;  %v4407_v31 = vand.u32 4294901760, %v4406_v45 }
 0x132   : > { %5328 = vmatpush1.bf16.msra.mxu1 %v6733_v0  ;;  %5282 = vmatprep.subr.bf16.mxu0 %v6742_v47  ;;  %v4419_v54 = vand.u32 4294901760, %v4418_v40  ;;  %v4429_v41 = vand.u32 4294901760, %v6873_v63  ;;  %v5333_v5 = vpack.c.bf16 %v4395_v13, %v4383_v24  ;;  %v5287_v25 = vpack.c.bf16 %v3832_v44, %v3820_v57 }
 0x133   : > { %5330 = vmatprep.subr.bf16.mxu1 %v6757_v29  ;;  %3798 = vmatprep.mubr.f32.mxu0 %v7182_v26  ;;  %v5335_v61 = vpack.c.bf16 %v4401_v36, %v4389_v23  ;;  %v5289_v7 = vpack.c.bf16 %v3850_v59, %v3838_v6  ;;  %v3856_v37 = vand.u32 4294901760, %v3855_v34  ;;  %v3866_v19 = vand.u32 4294901760, %v6817_v39  ;;  %v7224_v34 = vld [vmem:[#allocation12_spill] sm:$0xff] }
 0x134   : > { %4367 = vmatprep.mubr.f32.mxu1 %v7182_v26  ;;  %v4413_v50 = vand.u32 4294901760, %v4412_v58  ;;  %v7223_v1 = vand.u32 4294901760, %v6861_v51  ;;  %v4435_v32 = vand.u32 4294901760, %v6886_v12  ;;  %v5337_v44 = vpack.c.bf16 %v4419_v54, %v4407_v31 }
 0x135   : > { %5284 = vmatpush1.bf16.msra.mxu0 %v6774_v43  ;;  %v4430_v6 = vsub.f32 %v6873_v63, %v4429_v41  ;;  %v5291_v23 = vpack.c.bf16 %v3856_v37, %v3844_v62  ;;  %v3867_v13 = vsub.f32 %v6817_v39, %v3866_v19  ;;  %v5293_v62 = vpack.c.bf16 %v6712_v10, %v6710_v4 }
 0x136   : > { %5332 = vmatpush1.bf16.msra.mxu1 %v6784_v17  ;;  %3741 = vmatprep.subr.mxu0 %v6781_v8  ;;  %v4425_v17 = vand.u32 4294901760, %v4424_v27  ;;  %v3861_v45 = vsub.f32 %v6861_v51, %v7223_v1  ;;  %v4436_v24 = vsub.f32 %v6886_v12, %v4435_v32  ;;  %v5345_v40 = vpack.c.bf16 %v6764_v11, %v6759_v52 }
 0x137   : > { %4310 = vmatprep.subr.mxu1 %v6812_v53  ;;  %v5299_v57 = vpack.c.bf16 %v6778_v35, %v6776_v48  ;;  %v5347_v36 = vpack.c.bf16 %v6809_v16, %v6786_v28  ;;  %v7225_v58 = vand.u32 4294901760, %v6710_v4  ;;  %v7229_v54 = vand.u32 4294901760, %v6722_v38 }
 0x138   : > { %v5339_v59 = vpack.c.bf16 %v4425_v17, %v4413_v50  ;;  %v3862_v15 = vand.u32 4294901760, %v3861_v45  ;;  %v4437_v37 = vand.u32 4294901760, %v4436_v24  ;;  %v5295_v17 = vpack.c.bf16 %v6731_v21, %v6722_v38 }
 0x139   : > { %3743 = vmatpush1.msra.mxu0 %v6791_v55  ;;  %v7227_v50 = vand.u32 4294901760, %v6716_v9  ;;  %v7230_v1 = vand.u32 4294901760, %v6731_v21  ;;  %v7232_v4 = vand.u32 4294901760, %v6740_v22  ;;  %v7236_v38 = vand.u32 4294901760, %v6764_v11 }
 0x13a   : > { %4312 = vmatpush1.msra.mxu1 %v6819_v14  ;;  %5286 = vmatprep.subr.bf16.mxu0 %v5285_v46  ;;  %v7228_v46 = vand.u32 4294901760, %v6720_v56  ;;  %v7242_v11 = vand.u32 4294901760, %v6861_v51 }
 0x13b   : > { %5334 = vmatprep.subr.bf16.mxu1 %v5333_v5  ;;  %3804 = vmatmul.mubr.f32.vlgmr.msra.gmra.mrb[6].mxu0 %v5974_v30  ;;  %v4431_v5 = vand.u32 4294901760, %v4430_v6  ;;  %v5311_v45 = vpack.c.bf16 %v7230_v1, %v7229_v54  ;;  %v7233_v6 = vand.u32 4294901760, %v6748_v42 }
 0x13c   : > { %5288 = vmatpush1.bf16.msra.mxu0 %v5287_v25  ;;  %4373 = vmatmul.mubr.f32.vlgmr.msra.gmra.mrb[6].mxu1 %v5974_v30  ;;  %v3868_v30 = vand.u32 4294901760, %v3867_v13  ;;  %v5343_v25 = vpack.c.bf16 %v6740_v22, %v6735_v3  ;;  %v5357_v31 = vpack.c.bf16 %v7228_v46, %v7227_v50  ;;  %v7237_v13 = vld [vmem:[#allocation11_spill] sm:$0xff]  ;;  %v7239_v22 = vand.u32 4294901760, %v6778_v35 }
 0x13d   : > { %5336 = vmatpush1.bf16.msra.mxu1 %v5335_v61  ;;  %5290 = vmatprep.subr.bf16.mxu0 %v5289_v7  ;;  %v5341_v7 = vpack.c.bf16 %v6720_v56, %v6716_v9  ;;  %v5297_v61 = vpack.c.bf16 %v6755_v60, %v6748_v42  ;;  %v7235_v56 = vand.u32 4294901760, %v6759_v52  ;;  %v7241_v52 = vand.u32 4294901760, %v6809_v16 }
 0x13e   : > { %5338 = vmatprep.subr.bf16.mxu1 %v5337_v44  ;;  %3924 = vmatprep.mubr.f32.mxu0 %v7182_v26  ;;  %v7231_v44 = vand.u32 4294901760, %v6735_v3  ;;  %v7238_v3 = vand.u32 4294901760, %v6776_v48 }
 0x13f   : > { %4493 = vmatprep.mubr.f32.mxu1 %v7182_v26  ;;  %v5361_v21 = vpack.c.bf16 %v7236_v38, %v7235_v56 }
 0x140   : > { %5292 = vmatpush1.bf16.msra.mxu0 %v5291_v23  ;;  %v7234_v23 = vand.u32 4294901760, %v6755_v60  ;;  %v5315_v42 = vpack.c.bf16 %v7239_v22, %v7238_v3  ;;  %v7240_v60 = vand.u32 4294901760, %v6786_v28 }
 0x141   : > { %5340 = vmatpush1.bf16.msra.mxu1 %v5339_v59  ;;  %3863 = vmatprep.subr.mxu0 %v3862_v15 }
 0x142   : > { %4432 = vmatprep.subr.mxu1 %v4431_v5  ;;  %v5313_v9 = vpack.c.bf16 %v7234_v23, %v7233_v6  ;;  %v5363_v59 = vpack.c.bf16 %v7241_v52, %v7240_v60 }
 0x144   : > { %3869 = vmatpush1.msra.mxu0 %v3868_v30 }
 0x145   : > { %4438 = vmatpush1.msra.mxu1 %v4437_v37  ;;  %5294 = vmatprep.subr.bf16.mxu0 %v5293_v62 }
 0x146   : > { %5342 = vmatprep.subr.bf16.mxu1 %v5341_v7  ;;  %3926 = vmatmul.mubr.f32.vlgmr.msra.gmra.mrb[6].mxu0 %v5933_v20 }
 0x147   : > { %5296 = vmatpush1.bf16.msra.mxu0 %v5295_v17  ;;  %4495 = vmatmul.mubr.f32.vlgmr.msra.gmra.mrb[6].mxu1 %v5933_v20 }
 0x148   : > { %5344 = vmatpush1.bf16.msra.mxu1 %v5343_v25  ;;  %5298 = vmatprep.subr.bf16.mxu0 %v5297_v61 }
 0x149   : > { %5346 = vmatprep.subr.bf16.mxu1 %v5345_v40  ;;  %4016 = vmatprep.mubr.f32.mxu0 %v7182_v26 }
 0x14a   : > { %4585 = vmatprep.mubr.f32.mxu1 %v7182_v26 }
 0x14b   : > { %5300 = vmatpush1.bf16.msra.mxu0 %v5299_v57 }
 0x14c   : > { %5348 = vmatpush1.bf16.msra.mxu1 %v5347_v36  ;;  %3958 = vmatprep.subr.mxu0 %v6861_v51 }
 0x14d   : > { %4527 = vmatprep.subr.mxu1 %v6873_v63 }
 0x14f   : > { %3961 = vmatpush1.msra.mxu0 %v6817_v39 }
 0x150   : > { %4530 = vmatpush1.msra.mxu1 %v6886_v12  ;;  %5302 = vmatprep.subr.bf16.mxu0 %v6706_v18 }
 0x151   : > { %5350 = vmatprep.subr.bf16.mxu1 %v6714_v2  ;;  %4019 = vmatmul.mubr.f32.vlgmr.msra.gmra.mrb[6].mxu0 %v5945_v33 }
 0x152   : > { %5304 = vmatpush1.bf16.msra.mxu0 %v6729_v49  ;;  %4588 = vmatmul.mubr.f32.vlgmr.msra.gmra.mrb[6].mxu1 %v5945_v33  ;;  %v7226_v33 = vand.u32 4294901760, %v6712_v10  ;;  %v5359_v10 = vpack.c.bf16 %v7232_v4, %v7231_v44 }
 0x153   : > { %5352 = vmatpush1.bf16.msra.mxu1 %v6733_v0  ;;  %5306 = vmatprep.subr.bf16.mxu0 %v6742_v47 }
 0x154   : > { %5354 = vmatprep.subr.bf16.mxu1 %v6757_v29  ;;  %4099 = vmatprep.mubr.f32.mxu0 %v7182_v26  ;;  %v5309_v27 = vpack.c.bf16 %v7226_v33, %v7225_v58 }
 0x155   : > { %4668 = vmatprep.mubr.f32.mxu1 %v7182_v26 }
 0x156   : > { %5308 = vmatpush1.bf16.msra.mxu0 %v6774_v43 }
 0x157   : > { %5356 = vmatpush1.bf16.msra.mxu1 %v7224_v34  ;;  %4042 = vmatprep.subr.mxu0 %v6781_v8 }
 0x158   : > { %4611 = vmatprep.subr.mxu1 %v6812_v53 }
 0x15a   : > { %4044 = vmatpush1.msra.mxu0 %v6791_v55 }
 0x15b   : > { %4613 = vmatpush1.msra.mxu1 %v6819_v14  ;;  %5310 = vmatprep.subr.bf16.mxu0 %v5309_v27 }
 0x15c   : > { %5358 = vmatprep.subr.bf16.mxu1 %v5357_v31  ;;  %4103 = vmatmul.mubr.f32.vlgmr.msra.gmra.mrb[6].mxu0 %v7237_v13 }
 0x15d   : > { %5312 = vmatpush1.bf16.msra.mxu0 %v5311_v45  ;;  %4672 = vmatmul.mubr.f32.vlgmr.msra.gmra.mrb[6].mxu1 %v7237_v13 }
 0x15e   : > { %5360 = vmatpush1.bf16.msra.mxu1 %v5359_v10  ;;  %5314 = vmatprep.subr.bf16.mxu0 %v5313_v9 }
 0x15f   : > { %5362 = vmatprep.subr.bf16.mxu1 %v5361_v21  ;;  %4203 = vmatprep.mubr.f32.mxu0 %v7182_v26 }
 0x160   : > { %4772 = vmatprep.mubr.f32.mxu1 %v7182_v26 }
 0x161   : > { %5316 = vmatpush1.bf16.msra.mxu0 %v5315_v42 }
 0x162   : > { %5364 = vmatpush1.bf16.msra.mxu1 %v5363_v59  ;;  %4144 = vmatprep.subr.mxu0 %v7242_v11 }
 0x163   : > { %4713 = vmatprep.subr.mxu1 %v4429_v41 }
 0x165   : > { %4148 = vmatpush1.msra.mxu0 %v3866_v19 }
 0x166   : > { %4717 = vmatpush1.msra.mxu1 %v4435_v32  ;;  %5318 = vmatprep.subr.bf16.mxu0 %v6706_v18 }
 0x167   : > { %5366 = vmatprep.subr.bf16.mxu1 %v6714_v2  ;;  %4205 = vmatmul.mubr.f32.vlgmr.msra.gmra.mrb[6].mxu0 %v5933_v20 }
 0x168   : > { %5320 = vmatpush1.bf16.msra.mxu0 %v6729_v49  ;;  %4774 = vmatmul.mubr.f32.vlgmr.msra.gmra.mrb[6].mxu1 %v5933_v20 }
 0x169   : > { %5368 = vmatpush1.bf16.msra.mxu1 %v6733_v0  ;;  %5322 = vmatprep.subr.bf16.mxu0 %v6742_v47 }
 0x16a   : > { %5370 = vmatprep.subr.bf16.mxu1 %v6757_v29  ;;  %4285 = vmatprep.mubr.f32.mxu0 %v7182_v26 }
 0x16b   : > { %4854 = vmatprep.mubr.f32.mxu1 %v7182_v26 }
 0x16c   : > { %5324 = vmatpush1.bf16.msra.mxu0 %v6774_v43 }
 0x16d   : > { %5372 = vmatpush1.bf16.msra.mxu1 %v7224_v34  ;;  %4228 = vmatprep.subr.mxu0 %v6781_v8 }
 0x16e   : > { %4797 = vmatprep.subr.mxu1 %v6812_v53 }
 0x170   : > { %4230 = vmatpush1.msra.mxu0 %v6791_v55 }
 0x171   : > { %4799 = vmatpush1.msra.mxu1 %v6819_v14  ;;  %4287 = vmatmul.mubr.f32.vlgmr.msra.gmra.mrb[6].mxu0 %v5933_v20 }
 0x172   : > { %4856 = vmatmul.mubr.f32.vlgmr.msra.gmra.mrb[6].mxu1 %v5933_v20 }
 0x17e   : > { %v874_v18 = vpop.f32.mrb[0].mxu0 }
 0x17f   : > { %4862 = vst [vmem:[%s7022_s23] sm:$0xff] %v874_v18  ;;  %v1443_v26 = vpop.f32.mrb[0].mxu1  ;;  %v876_v2 = vpop.f32.mrb[1].mxu0 }
 0x180   : > { %4864 = vst [vmem:[%s7022_s23 + $0x10] sm:$0xff] %v1443_v26  ;;  %4863 = vst [vmem:[%s7022_s23 + $0x8] sm:$0xff] %v876_v2  ;;  %v1445_v20 = vpop.f32.mrb[1].mxu1 }
 0x181   : > { %4865 = vst [vmem:[%s7022_s23 + $0x18] sm:$0xff] %v1445_v20 }
 0x1c0   : > { %v2012_v49 = vpop.f32.mrb[2].mxu0 }
 0x1c1   : > { %4866 = vst [vmem:[%s7022_s23 + $0x20] sm:$0xff] %v2012_v49  ;;  %v2581_v0 = vpop.f32.mrb[2].mxu1  ;;  %v2014_v47 = vpop.f32.mrb[3].mxu0 }
 0x1c2   : > { %4868 = vst [vmem:[%s7022_s23 + $0x30] sm:$0xff] %v2581_v0  ;;  %4867 = vst [vmem:[%s7022_s23 + $0x28] sm:$0xff] %v2014_v47  ;;  %v2583_v29 = vpop.f32.mrb[3].mxu1 }
 0x1c3   : > { %4869 = vst [vmem:[%s7022_s23 + $0x38] sm:$0xff] %v2583_v29 }
 0x202   : > { %v3150_v43 = vpop.f32.mrb[4].mxu0 }
 0x203   : > { %4870 = vst [vmem:[%s7022_s23 + $0x40] sm:$0xff] %v3150_v43  ;;  %v3719_v48 = vpop.f32.mrb[4].mxu1  ;;  %v3152_v35 = vpop.f32.mrb[5].mxu0 }
 0x204   : > { %4872 = vst [vmem:[%s7022_s23 + $0x50] sm:$0xff] %v3719_v48  ;;  %4871 = vst [vmem:[%s7022_s23 + $0x48] sm:$0xff] %v3152_v35  ;;  %v3721_v8 = vpop.f32.mrb[5].mxu1 }
 0x205   : > { %4873 = vst [vmem:[%s7022_s23 + $0x58] sm:$0xff] %v3721_v8 }
 0x244   : > { %v4288_v28 = vpop.f32.mrb[6].mxu0 }
 0x245   : > { %4874 = vst [vmem:[%s7022_s23 + $0x60] sm:$0xff] %v4288_v28  ;;  %v4857_v12 = vpop.f32.mrb[6].mxu1  ;;  %v4290_v55 = vpop.f32.mrb[7].mxu0 }
 0x246   : > { %4876 = vst [vmem:[%s7022_s23 + $0x70] sm:$0xff] %v4857_v12  ;;  %4875 = vst [vmem:[%s7022_s23 + $0x68] sm:$0xff] %v4290_v55  ;;  %v4859_v63 = vpop.f32.mrb[7].mxu1 }
 0x247   : > { %4877 = vst [vmem:[%s7022_s23 + $0x78] sm:$0xff] %v4859_v63 }
 0x248   : > { %5587 = shalt.err (!%p5584_p13)
}
 0x249   : > { %s5588_s19 = scalar_lea.hbm %s7042_s8, 2048  ;;  %s5592_s4 = scalar_lea.hbm %s7091_s2, 4096 }
 0x24a   : > { %p5589_p7 = scmp.ne.s32.totalorder %s7042_s8, %s5588_s19  ;;  %p5593_p1 = scmp.lt.u32.totalorder %s7042_s8, %s7091_s2 }
 0x24b   : > { %p5594_p11 = scmp.lt.u32.totalorder %s5592_s4, %s5588_s19  ;;  %p5596_p9 = scmp.lt.u32.totalorder %s5588_s19, %s7042_s8 }
 0x24c   : > { %p5590_p3 = pnand %p5589_p7, %p7243_p10 }
 0x24d   : > { %p5595_p8 = por %p5594_p11, %p5593_p1 }
 0x24e   : > { %p5591_p12 = pneg %p5590_p3 }
 0x24f   : > { %p5597_p2 = por %p5596_p9, %p5595_p8 }
 0x251   : > { %p5598_p4 = pnand %p5597_p2, %p5591_p12 }
 0x253   : > { %5601 = shalt.err (!%p5598_p4)
}
 0x254   : > { %5461 = dma.vmem_to_hbm [thread:$0]  (%p7243_p10), %s7044_s30, 2048, %s7042_s8, %s4879_s13  }
 0x255 PF: > { %s4905_s29 = sand.u32 1, %s5632_s9   ;;  %p7244_p5 = scmp.ne.s32.totalorder %s7164_s22, 0 }
 0x256   : > { %p7245_p0 = scmp.ge.s32.totalorder %s5644_s12, 2  ;;  %s4906_s7 = scalar_lea.sflag [#allocation4], %s4905_s29 }
 0x258   : > { %p5472_p6 = pnand %p7245_p0, %p7244_p5 }
 0x25a   : > { %5627 = dma.done.wait (!%p5472_p6), %s4906_s7, 2048  }
 0x25b   : > { %5629 = vsyncadd (!%p5472_p6), %s4906_s7, 4294965248  ;;  %p16_p13 = scmp.ge.s32.totalorder %s5693_s15, 4   ;;  %s7246_s9 = smov %s5636_s10 }
 0x25c   : > { %s7247_s10 = smov %s5640_s11  ;;  %s7248_s11 = smov %s5705_s18 }
 0x25d   : > { %s7249_s12 = smov %s5693_s15  ;;  %18 = sbr.rel (!%p16_p13) target bundleno = 6 (0x6), region = 77 }
 0x264   :  { %4911 = vsyncpa [#allocation3], 1 }
 0x265   :  { %4913 = vsyncpa [#allocation3 + $0x1], 1 }
 0x266   :  { %4914 = vsyncpa [#allocation6], 1 }
 0x267   :  { %4915 = vsyncpa [#allocation4], 1 }
 0x268   :  { %4917 = vsyncpa [#allocation4 + $0x1], 1 }

</bundles_post_ra>
